<compile_context>
chip_gen: v6e
topology: v6e:2x2x1
jax: 0.10.0
libtpu: 0.0.40
codegen_flags: <defaults>
</compile_context>

<pallas_src>
import jax
import jax.numpy as jnp
from jax import lax
from jax.experimental import pallas as pl
from jax.experimental.pallas import tpu as pltpu

KERNELS = (3, 5, 7)      # config.kernels (odd -> 'same' conv padding)
FEATURES_L = 16          # config.features_L (H)
W_SIZE = 54              # self.W_size       (W)
HIDDEN = 32              # hidden_channels

H = FEATURES_L
W = W_SIZE
PAD = (max(KERNELS) - 1) // 2                       # 3 (padding for the widest kernel)
HW = H * W                                          # 864 = flattened 'same'-conv output
N_TAPS = 2 * PAD + 2                                # 7 shifted rows + 1 ones row = 8
H_OUTS = tuple(H - k + 1 for k in KERNELS)          # (14, 12, 10) rows after maxpool
L_OUTS = tuple(h * W for h in H_OUTS)               # (756, 648, 540) flattened lengths
OUT_OFFS = (0, L_OUTS[0], L_OUTS[0] + L_OUTS[1])    # branch offsets in the fused output
TOTAL_L = sum(L_OUTS)                               # 1944
ROW_OFFS = tuple(PAD - (k - 1) // 2 for k in KERNELS)  # (2, 1, 0) tap-row offset per branch


def _make_fused_kernel(block_n: int):
    def kernel(x_ref, w_ref, alpha_ref, out_ref):
        # x_ref:     (block_n, N_TAPS, HW)   7 row-shifted input copies + ones row
        # w_ref:     (3*HIDDEN, N_TAPS)      per-branch taps scattered into the 8 tap
        #                                    rows, bias in the last column
        # alpha_ref: (1,) in SMEM            shared PReLU slope (branch 0 only)
        # out_ref:   (block_n, HIDDEN, TOTAL_L)  fused / already-concatenated output
        alpha = alpha_ref[0]

        def batch_body(bi, carry):
            taps = x_ref[bi]                                     # (8, 864) aligned rows

            for br, k in enumerate(KERNELS):                     # static unroll, 3 branches
                l_out = L_OUTS[br]
                w_br = w_ref[pl.ds(br * HIDDEN, HIDDEN), :]      # (32, 8)

                # Conv2d((k,1), 'same' along H) + bias as one small MXU matmul.
                acc = jnp.dot(w_br, taps, preferred_element_type=jnp.float32)  # (32, 864)

                # Branch 0: PReLU (slope from SMEM); branches 1/2: plain ReLU,
                # specialized at trace time.
                if br == 0:
                    act = jnp.where(acc > 0.0, acc, alpha * acc)
                else:
                    act = jnp.maximum(acc, 0.0)

                # MaxPool2d((k,1), stride 1) along H via a shift-max tree on the
                # flattened (H*W,) axis (row shift == W-lane shift).
                m1 = jnp.maximum(act[:, : (H - 1) * W],
                                 act[:, W: W + (H - 1) * W])          # window 2
                if k == 3:
                    pooled = jnp.maximum(m1[:, :l_out],
                                         act[:, 2 * W: 2 * W + l_out])  # window 3
                else:
                    m2 = jnp.maximum(m1[:, : (H - 3) * W],
                                     m1[:, 2 * W: 2 * W + (H - 3) * W])  # window 4
                    if k == 5:
                        pooled = jnp.maximum(m2[:, :l_out],
                                             act[:, 4 * W: 4 * W + l_out])  # window 5
                    else:  # k == 7
                        pooled = jnp.maximum(m2[:, :l_out],
                                             m2[:, 3 * W: 3 * W + l_out])   # window 7

                out_ref[pl.ds(bi, 1), pl.ds(0, HIDDEN),
                        pl.ds(OUT_OFFS[br], l_out)] = pooled[None, :, :]
            return carry

        lax.fori_loop(0, block_n, batch_body, 0, unroll=block_n <= 4)

    return kernel


def convs_layer(x, params, prelu_alpha, *, block_n=None):
    """Full ConvsLayer.forward.

    x: (N, 1, H, W) float; params: [(weight (32,1,k,1), bias (32,)) per branch];
    prelu_alpha: scalar PReLU slope for branch 0 (branches 1/2 are ReLU).
    Returns (N, 32, sum_k (H-k+1)*W) == concat(branch features, axis=2).
    """
    N = x.shape[0]
    assert x.shape[1:] == (1, H, W)

    if block_n is None:
        # >= 2 grid blocks whenever N >= 2 so both v7x TensorCores get work; cap at 16
        # (output block 16 x ~249 KB, double-buffered ~8 MB -> fits the 32 MiB limit).
        block_n = max(1, min(16, N // 2))
    grid_n = -(-N // block_n)
    n_pad = grid_n * block_n - N

    xs = x[:, 0].astype(jnp.float32)
    if n_pad:
        xs = jnp.pad(xs, ((0, n_pad), (0, 0), (0, 0)))
    # Pad H once with pad = 3 (max kernel) and build the 7 row-shifted, flattened copies
    # plus a ones row (bias folding) -> (N', N_TAPS, HW); every in-kernel tap is then an
    # aligned whole-row read.
    x_pad = jnp.pad(xs, ((0, 0), (PAD, PAD), (0, 0)))                  # (N', H+2*PAD, W)
    nb = x_pad.shape[0]
    shifted = [x_pad[:, dh:dh + H, :].reshape(nb, HW) for dh in range(2 * PAD + 1)]
    shifted.append(jnp.ones((nb, HW), jnp.float32))
    x_taps = jnp.stack(shifted, axis=1)                                # (N', 8, 864)

    # Pack per-branch conv weights into the shared 8 tap rows; bias in the last column.
    w_blocks = []
    for (w, b), k, r0 in zip(params, KERNELS, ROW_OFFS):
        wm = jnp.zeros((HIDDEN, N_TAPS), jnp.float32)
        wm = wm.at[:, r0:r0 + k].set(w[:, 0, :, 0].astype(jnp.float32))
        wm = wm.at[:, N_TAPS - 1].set(b.astype(jnp.float32))
        w_blocks.append(wm)
    w_packed = jnp.concatenate(w_blocks, axis=0)                       # (96, 8)

    alpha_arr = jnp.asarray([prelu_alpha], jnp.float32)

    out = pl.pallas_call(
        _make_fused_kernel(block_n),
        out_shape=jax.ShapeDtypeStruct((grid_n * block_n, HIDDEN, TOTAL_L), jnp.float32),
        grid=(grid_n,),
        in_specs=[
            pl.BlockSpec((block_n, N_TAPS, HW), lambda n: (n, 0, 0)),
            pl.BlockSpec((len(KERNELS) * HIDDEN, N_TAPS), lambda n: (0, 0)),
            pl.BlockSpec(memory_space=pltpu.MemorySpace.SMEM),
        ],
        out_specs=pl.BlockSpec((block_n, HIDDEN, TOTAL_L), lambda n: (n, 0, 0)),
        compiler_params=pltpu.CompilerParams(
            dimension_semantics=("parallel",),
            vmem_limit_bytes=32 * 1024 * 1024,
        ),
    )(x_taps, w_packed, alpha_arr)
    return out[:N]


def _ref_branch(x, weight, bias, alpha, k):
    """Pure-JAX reference (conv + PReLU/ReLU + maxpool), for the correctness check."""
    pad = (k - 1) // 2
    conv = jax.lax.conv_general_dilated(
        x, weight, window_strides=(1, 1), padding=((pad, pad), (0, 0)),
        dimension_numbers=("NCHW", "OIHW", "NCHW"))
    conv = conv + bias[None, :, None, None]
    act = jnp.maximum(conv, 0.0) + alpha * jnp.minimum(conv, 0.0)
    pooled = jax.lax.reduce_window(
        act, -jnp.inf, jax.lax.max, (1, 1, k, 1), (1, 1, 1, 1), "VALID")
    return pooled.reshape(x.shape[0], HIDDEN, -1)


if __name__ == "__main__":
    key = jax.random.PRNGKey(0)
    ks = jax.random.split(key, 1 + 2 * len(KERNELS))

    N = 2
    x = jax.random.normal(ks[0], (N, 1, FEATURES_L, W_SIZE), jnp.float32)

    # Deterministic parameter init (mirrors Conv2d's uniform(-1/sqrt(fan_in), ..)).
    params = []
    for i, k in enumerate(KERNELS):
        fan_in = 1 * k * 1
        bound = 1.0 / (fan_in ** 0.5)
        w = jax.random.uniform(ks[1 + 2 * i], (HIDDEN, 1, k, 1), jnp.float32,
                               -bound, bound)
        b = jax.random.uniform(ks[2 + 2 * i], (HIDDEN,), jnp.float32, -bound, bound)
        params.append((w, b))
    # Branch 1 uses PReLU (default init 0.25, single shared slope); branches 2/3 ReLU.
    prelu_alpha = 0.25
    alphas = (prelu_alpha, 0.0, 0.0)

    features = convs_layer(x, params, prelu_alpha)
    features = jax.block_until_ready(features)

    # Sanity check against the pure-JAX reference (tolerance slightly loosened vs the
    # VPU version: the conv now runs on the MXU multi-pass f32 path).
    ref = jnp.concatenate(
        [_ref_branch(x, w, b, a, k) for (w, b), a, k in zip(params, alphas, KERNELS)],
        axis=2)
    assert features.shape == (N, HIDDEN,
                              sum((FEATURES_L - k + 1) * W_SIZE for k in KERNELS))
    assert jnp.allclose(features, ref, atol=1e-4, rtol=1e-4)

    print("KERNEL_OK")
</pallas_src>

<mosaic_0001>
module attributes {stable_mosaic.version = 11 : i64} {
  func.func @kernel(%arg0: i32, %arg1: memref<1x8x864xf32, #tpu.memory_space<vmem>>, %arg2: memref<96x8xf32, #tpu.memory_space<vmem>>, %arg3: memref<1xf32, #tpu.memory_space<smem>>, %arg4: memref<1x32x1944xf32, #tpu.memory_space<vmem>>) attributes {dimension_semantics = [#tpu.dimension_semantics<parallel>], iteration_bounds = array<i64: 2>, scalar_prefetch = 0 : i64, scratch_operands = 0 : i64, tpu.core_type = #tpu.core_type<tc>, window_params = [{transform_indices = @transform_0, window_bounds = array<i64: 1, 8, 864>}, {pipeline_mode = #tpu.pipeline_mode<synchronous>, transform_indices = @transform_1, window_bounds = array<i64: 96, 8>}, {transform_indices = @transform_2, window_bounds = array<i64: 1>}, {transform_indices = @transform_3, window_bounds = array<i64: 1, 32, 1944>}]} {
    %c0 = arith.constant 0 : index
    %0 = memref.load %arg3[%c0] : memref<1xf32, #tpu.memory_space<smem>>
    %c0_i32 = arith.constant 0 : i32
    %1 = arith.index_cast %c0_i32 : i32 to index
    %c0_0 = arith.constant 0 : index
    %c0_1 = arith.constant 0 : index
    %2 = vector.load %arg1[%1, %c0_0, %c0_1] : memref<1x8x864xf32, #tpu.memory_space<vmem>>, vector<1x8x864xf32>
    %3 = vector.shape_cast %2 : vector<1x8x864xf32> to vector<8x864xf32>
    %c0_2 = arith.constant 0 : index
    %c0_3 = arith.constant 0 : index
    %4 = vector.load %arg2[%c0_2, %c0_3] : memref<96x8xf32, #tpu.memory_space<vmem>>, vector<32x8xf32>
    %cst = arith.constant dense<0.000000e+00> : vector<32x864xf32>
    %5 = tpu.matmul %4, %3, %cst {dimension_numbers = #tpu.dot_dimension_numbers<[1], [0], [0], [1], [0, 0, 1, 1], [], []>} : vector<32x8xf32>, vector<8x864xf32>, vector<32x864xf32> -> vector<32x864xf32>
    %cst_4 = arith.constant 0.000000e+00 : f32
    %6 = vector.broadcast %cst_4 : f32 to vector<32x864xf32>
    %7 = arith.cmpf ogt, %5, %6 : vector<32x864xf32>
    %8 = vector.broadcast %0 : f32 to vector<32x864xf32>
    %9 = arith.mulf %8, %5 : vector<32x864xf32>
    %10 = arith.select %7, %5, %9 : vector<32x864xi1>, vector<32x864xf32>
    %11 = vector.extract_strided_slice %10 {offsets = [0, 0], sizes = [32, 810], strides = [1, 1]} : vector<32x864xf32> to vector<32x810xf32>
    %12 = vector.extract_strided_slice %10 {offsets = [0, 54], sizes = [32, 810], strides = [1, 1]} : vector<32x864xf32> to vector<32x810xf32>
    %13 = arith.maximumf %11, %12 : vector<32x810xf32>
    %14 = vector.extract_strided_slice %13 {offsets = [0, 0], sizes = [32, 756], strides = [1, 1]} : vector<32x810xf32> to vector<32x756xf32>
    %15 = vector.extract_strided_slice %10 {offsets = [0, 108], sizes = [32, 756], strides = [1, 1]} : vector<32x864xf32> to vector<32x756xf32>
    %16 = arith.maximumf %14, %15 : vector<32x756xf32>
    %17 = vector.shape_cast %16 : vector<32x756xf32> to vector<1x32x756xf32>
    %18 = arith.index_cast %c0_i32 : i32 to index
    %c0_5 = arith.constant 0 : index
    %c0_6 = arith.constant 0 : index
    %19 = vector.load %arg4[%18, %c0_5, %c0_6] : memref<1x32x1944xf32, #tpu.memory_space<vmem>>, vector<1x32x756xf32>
    tpu.vector_store %arg4[%18, %c0_5, %c0_6], %17 {strides = array<i32>} : memref<1x32x1944xf32, #tpu.memory_space<vmem>>, vector<1x32x756xf32>,
    %c32 = arith.constant 32 : index
    %c0_7 = arith.constant 0 : index
    %20 = vector.load %arg2[%c32, %c0_7] : memref<96x8xf32, #tpu.memory_space<vmem>>, vector<32x8xf32>
    %cst_8 = arith.constant dense<0.000000e+00> : vector<32x864xf32>
    %21 = tpu.matmul %20, %3, %cst_8 {dimension_numbers = #tpu.dot_dimension_numbers<[1], [0], [0], [1], [0, 0, 1, 1], [], []>} : vector<32x8xf32>, vector<8x864xf32>, vector<32x864xf32> -> vector<32x864xf32>
    %cst_9 = arith.constant 0.000000e+00 : f32
    %22 = vector.broadcast %cst_9 : f32 to vector<32x864xf32>
    %23 = arith.maximumf %21, %22 : vector<32x864xf32>
    %24 = vector.extract_strided_slice %23 {offsets = [0, 0], sizes = [32, 810], strides = [1, 1]} : vector<32x864xf32> to vector<32x810xf32>
    %25 = vector.extract_strided_slice %23 {offsets = [0, 54], sizes = [32, 810], strides = [1, 1]} : vector<32x864xf32> to vector<32x810xf32>
    %26 = arith.maximumf %24, %25 : vector<32x810xf32>
    %27 = vector.extract_strided_slice %26 {offsets = [0, 0], sizes = [32, 702], strides = [1, 1]} : vector<32x810xf32> to vector<32x702xf32>
    %28 = vector.extract_strided_slice %26 {offsets = [0, 108], sizes = [32, 702], strides = [1, 1]} : vector<32x810xf32> to vector<32x702xf32>
    %29 = arith.maximumf %27, %28 : vector<32x702xf32>
    %30 = vector.extract_strided_slice %29 {offsets = [0, 0], sizes = [32, 648], strides = [1, 1]} : vector<32x702xf32> to vector<32x648xf32>
    %31 = vector.extract_strided_slice %23 {offsets = [0, 216], sizes = [32, 648], strides = [1, 1]} : vector<32x864xf32> to vector<32x648xf32>
    %32 = arith.maximumf %30, %31 : vector<32x648xf32>
    %33 = vector.shape_cast %32 : vector<32x648xf32> to vector<1x32x648xf32>
    %34 = arith.index_cast %c0_i32 : i32 to index
    %c0_10 = arith.constant 0 : index
    %c756 = arith.constant 756 : index
    %35 = vector.load %arg4[%34, %c0_10, %c756] : memref<1x32x1944xf32, #tpu.memory_space<vmem>>, vector<1x32x648xf32>
    tpu.vector_store %arg4[%34, %c0_10, %c756], %33 {strides = array<i32>} : memref<1x32x1944xf32, #tpu.memory_space<vmem>>, vector<1x32x648xf32>,
    %c64 = arith.constant 64 : index
    %c0_11 = arith.constant 0 : index
    %36 = vector.load %arg2[%c64, %c0_11] : memref<96x8xf32, #tpu.memory_space<vmem>>, vector<32x8xf32>
    %cst_12 = arith.constant dense<0.000000e+00> : vector<32x864xf32>
    %37 = tpu.matmul %36, %3, %cst_12 {dimension_numbers = #tpu.dot_dimension_numbers<[1], [0], [0], [1], [0, 0, 1, 1], [], []>} : vector<32x8xf32>, vector<8x864xf32>, vector<32x864xf32> -> vector<32x864xf32>
    %cst_13 = arith.constant 0.000000e+00 : f32
    %38 = vector.broadcast %cst_13 : f32 to vector<32x864xf32>
    %39 = arith.maximumf %37, %38 : vector<32x864xf32>
    %40 = vector.extract_strided_slice %39 {offsets = [0, 0], sizes = [32, 810], strides = [1, 1]} : vector<32x864xf32> to vector<32x810xf32>
    %41 = vector.extract_strided_slice %39 {offsets = [0, 54], sizes = [32, 810], strides = [1, 1]} : vector<32x864xf32> to vector<32x810xf32>
    %42 = arith.maximumf %40, %41 : vector<32x810xf32>
    %43 = vector.extract_strided_slice %42 {offsets = [0, 0], sizes = [32, 702], strides = [1, 1]} : vector<32x810xf32> to vector<32x702xf32>
    %44 = vector.extract_strided_slice %42 {offsets = [0, 108], sizes = [32, 702], strides = [1, 1]} : vector<32x810xf32> to vector<32x702xf32>
    %45 = arith.maximumf %43, %44 : vector<32x702xf32>
    %46 = vector.extract_strided_slice %45 {offsets = [0, 0], sizes = [32, 540], strides = [1, 1]} : vector<32x702xf32> to vector<32x540xf32>
    %47 = vector.extract_strided_slice %45 {offsets = [0, 162], sizes = [32, 540], strides = [1, 1]} : vector<32x702xf32> to vector<32x540xf32>
    %48 = arith.maximumf %46, %47 : vector<32x540xf32>
    %49 = vector.shape_cast %48 : vector<32x540xf32> to vector<1x32x540xf32>
    %50 = arith.index_cast %c0_i32 : i32 to index
    %c0_14 = arith.constant 0 : index
    %c1404 = arith.constant 1404 : index
    %51 = vector.load %arg4[%50, %c0_14, %c1404] : memref<1x32x1944xf32, #tpu.memory_space<vmem>>, vector<1x32x540xf32>
    tpu.vector_store %arg4[%50, %c0_14, %c1404], %49 {strides = array<i32>} : memref<1x32x1944xf32, #tpu.memory_space<vmem>>, vector<1x32x540xf32>,
    %c1_i32 = arith.constant 1 : i32
    return
  }
  func.func @transform_0(%arg0: i32) -> (i32, i32, i32) {
    %c0_i32 = arith.constant 0 : i32
    %c0_i32_0 = arith.constant 0 : i32
    %c0_i32_1 = arith.constant 0 : i32
    return %arg0, %c0_i32, %c0_i32_0 : i32, i32, i32
  }
  func.func @transform_1(%arg0: i32) -> (i32, i32) {
    %c0_i32 = arith.constant 0 : i32
    %c0_i32_0 = arith.constant 0 : i32
    %c0_i32_1 = arith.constant 0 : i32
    return %c0_i32, %c0_i32_0 : i32, i32
  }
  func.func @transform_2(%arg0: i32) -> i32 {
    %c0_i32 = arith.constant 0 : i32
    %c0_i32_0 = arith.constant 0 : i32
    return %c0_i32 : i32
  }
  func.func @transform_3(%arg0: i32) -> (i32, i32, i32) {
    %c0_i32 = arith.constant 0 : i32
    %c0_i32_0 = arith.constant 0 : i32
    %c0_i32_1 = arith.constant 0 : i32
    return %arg0, %c0_i32, %c0_i32_0 : i32, i32, i32
  }
}

</mosaic_0001>

<bundles_post_ra>
// kernel: tpu_custom_call.1
= control target key start
LH: loop header
LB: loop body
LE: loop exit
PB: predicated region body
PF: predicated region fallthrough
CT: control target
= control target key end

     0   :  { %s5135_s0 = inlined_call_operand.hbm [shape: f32[2,8,864], index: 0, kind: input, shape index: {}]   ;;  %s5136_s1 = inlined_call_operand.vmem [shape: f32[96,8], index: 1, kind: input, shape index: {}]   ;;  %s5137_s2 = inlined_call_operand.<no memory space> [shape: f32[1], index: 2, kind: input, shape index: {}]   ;;  %s5138_s3 = inlined_call_operand.hbm [shape: f32[2,32,1944], index: 3, kind: output, shape index: {}]  }
   0x1   :  { %8 = sst [smem:[#allocation2]] %s5137_s2 }
   0x2   :  { %9 = vsyncpa [#allocation4], 0 }
   0x3   :  { %11 = vsyncpa [#allocation4 + $0x1], 0 }
   0x4   :  { %12 = vsyncpa [#allocation5], 0 }
   0x5   :  { %14 = vsyncpa [#allocation5 + $0x1], 0  ;;  %s3269_s14 = smov 0   ;;  %s3271_s15 = smov 0  }
   0x6   :  { %s3273_s16 = smov 0   ;;  %s3275_s17 = smov 0  }
   0x7 LB: > { %s3290_s2 = sadd.s32 4294967295, %s3233_s17   ;;  %s2982_s18 = sadd.s32 4294967294, %s3233_s17   ;;  %s3233_s17 = sphi %s3275_s17, %s5343_s17   ;;  %s3229_s16 = sphi %s3273_s16, %s5342_s16   ;;  %s3225_s15 = sphi %s3271_s15, %s5341_s15   ;;  %s3221_s14 = sphi %s3269_s14, %s5340_s14  }
   0x8   : > { %s3294_s19 = sadd.s32 1, %s3233_s17   ;;  %s27_s20 = sadd.s32 1, %s3229_s16 }
   0x9   : > { %s24_s21 = ssub.s32 %s3233_s17, %s3294_s19  ;;  %p34_p0 = scmp.ne.s32.totalorder %s3229_s16, %s3225_s15 }
   0xa   : > { %p25_p1 = scmp.eq.s32.totalorder %s24_s21, 0  ;;  %p35_p2 = scmp.eq.s32.totalorder %s3233_s17, 0 }
   0xb   : > { %p40_p3 = scmp.ne.s32.totalorder %s3225_s15, %s3221_s14  ;;  %p41_p4 = scmp.eq.s32.totalorder %s3290_s2, 0 }
   0xc   : > { %s3306_s22 = scalar_select %p25_p1, %s3229_s16, %s27_s20  }
   0xd   : > { %p36_p5 = por %p35_p2, %p34_p0  ;;  %p3308_p6 = por %p41_p4, %p40_p3 }
   0xe   : > { %p106_p7 = scmp.eq.s32.totalorder %s3290_s2, 1  ;;  %p112_p8 = scmp.eq.s32.totalorder %s2982_s18, 1 }
   0xf   : > { %s5211_s23 = scalar_select %p3308_p6, 1, 0 }
  0x10   : > { %p3098_p10 = scmp.lt.s32.totalorder %s3233_s17, 2  ;;  %p3315_p11 = por %p106_p7, %p34_p0 }
  0x11   : > { %p3319_p12 = por %p112_p8, %p40_p3  ;;  %s138_s26 = sand.u32 1, %s3229_s16  }
  0x12   : > { %s5212_s24 = scalar_select %p3315_p11, 1, 0 }
  0x13   : > { %s5213_s25 = scalar_select %p3319_p12, 1, 0 }
  0x14   : > { %s3084_s27 = smul.u32 896, %s3233_s17  ;;  %p3330_p13 = pnand %p3098_p10, %p36_p5 }
  0x15   : > { %s3083_s28 = smul.u32 56, %s138_s26  ;;  %s139_s8 = scalar_lea.sflag [#allocation4], %s138_s26 }
  0x16   : > { %s3328_s4 = scalar_lea.hbm %s5135_s0, %s3084_s27  ;;  %p3143_p3 = pneg %p3330_p13 }
  0x17   : > { %s142_s6 = scalar_lea.vmem [#allocation3], %s3083_s28  ;;  %s3141_s9 = scalar_lea.hbm %s3328_s4, 896 }
  0x18   : > { %s150_s7 = sshll.u32 %s142_s6, 4  ;;  %p3142_p2 = scmp.ne.s32.totalorder %s3328_s4, %s3141_s9  ;;  %s151_s7 = int_to_ptr.vmem [resolvable:$true] %s150_s7 }
  0x19   : > { %s3146_s12 = scalar_lea.hbm %s5135_s0, 1792  ;;  %p3147_p5 = scmp.lt.s32.totalorder %s3328_s4, %s5135_s0 }
  0x1a   : > { %p3144_p4 = pnand %p3143_p3, %p3142_p2  ;;  %p3148_p8 = scmp.lt.s32.totalorder %s3146_s12, %s3141_s9 }
  0x1c   : > { %p3145_p7 = pneg %p3144_p4  ;;  %p3149_p10 = por %p3148_p8, %p3147_p5 }
  0x1e   : > { %p3150_p9 = pnand %p3149_p10, %p3145_p7 }
  0x20   : > { %3153 = shalt.err (!%p3150_p9)
}
  0x21   : > { %s3154_s20 = scalar_lea.vmem %s151_s7, 896  ;;  %s3235_s21 = smov [#allocation3]  }
  0x22   : > { %p3155_p0 = scmp.ne.s32.totalorder %s151_s7, %s3154_s20  ;;  %s3159_s26 = sshll.u32 %s3235_s21, 4  ;;  %s3160_s26 = int_to_ptr.vmem [resolvable:$false] %s3159_s26 }
  0x23   : > { %s3161_s27 = scalar_lea.vmem %s3160_s26, 1792  ;;  %p3162_p2 = scmp.lt.s32.totalorder %s151_s7, %s3160_s26 }
  0x24   : > { %p3157_p1 = pnand %p3155_p0, %p3143_p3  ;;  %p3163_p4 = scmp.lt.s32.totalorder %s3161_s27, %s3154_s20 }
  0x26   : > { %p3158_p12 = pneg %p3157_p1  ;;  %p3164_p11 = por %p3163_p4, %p3162_p2 }
  0x28   : > { %p3165_p6 = pnand %p3164_p11, %p3158_p12 }
  0x2a   : > { %3168 = shalt.err (!%p3165_p6)
}
  0x2b   : > { %3093 = dma.hbm_to_vmem [thread:$0]  (!%p3330_p13), %s3328_s4, 896, %s151_s7, %s139_s8  }
  0x2c   : > { %p5215_p9 = scmp.lt.s32.totalorder %s3233_s17, 3  ;;  %p5216_p7 = scmp.ge.s32.totalorder %s3233_s17, 1 }
  0x2e   : > { %p156_p5 = pnand %p5216_p7, %p5215_p9 }
  0x30   : > { %159 = sbr.rel (%p156_p5) target bundleno = 1037 (0x40d), region = 32 }
  0x35   : > { %s3355_s28 = sand.u32 1, %s3225_s15   ;;  %p5217_p6 = scmp.ne.s32.totalorder %s5211_s23, 0 }
  0x36   : > { %s3085_s29 = smul.u32 56, %s3355_s28  ;;  %s162_s30 = scalar_lea.sflag [#allocation4], %s3355_s28 }
  0x38   : > { %s165_s6 = scalar_lea.vmem [#allocation3], %s3085_s29 }
  0x39   : > { %3212 = dma.done.wait (%p5217_p6), %s162_s30, 896  }
  0x3a   : > { %3214 = vsyncadd (%p5217_p6), %s162_s30, 4294966400  ;;  %v3236_v0 = vmov 0.0   ;;  %v3365_v1 = vld [vmem:[%s165_s6 + $0x8] sm:$0xff]  ;;  %v3367_v2 = vld [vmem:[%s165_s6] sm:$0xff]  ;;  %vm200_vm0 = vcmask 64512   ;;  %s188_s10 = sld [smem:[#allocation2]] }
  0x3b   : > { %277 = vmatprep.mubr.f32.mxu0 %v3236_v0  ;;  %295 = vmatprep.mubr.f32.mxu1 %v3236_v0  ;;  %v196_v3 = vld [vmem:[%s5136_s1] sm:$0xff]  ;;  %v199_v4 = vld [vmem:[%s5136_s1 + $0x18] sm:$0xff]  ;;  %v3379_v6 = vld [vmem:[%s165_s6 + $0x10] sm:$0xff]  ;;  %s3237_s11 = smov 74   ;;  %s3238_s12 = smov 20  }
  0x3c   : > { %243 = vmatprep.subr.mxu0 %v3365_v1  ;;  %3081 = vmatprep.subr.mxu1 %v3365_v1  ;;  %v192_v5 = vld [vmem:[%s165_s6 + $0x18] sm:$0xff]  ;;  %v3383_v7 = vld [vmem:[%s165_s6 + $0x28] sm:$0xff]  ;;  %v3385_v8 = vld [vmem:[%s165_s6 + $0x30] sm:$0xff]  ;;  %s3239_s13 = smov 40   ;;  %s2987_s18 = sshll.u32 %s3355_s28, 9 }
  0x3d   : > { %244 = vmatpush1.msra.mxu0 %v3367_v2  ;;  %3082 = vmatpush1.msra.mxu1 %v3367_v2  ;;  %v197_v9 = vld [vmem:[%s5136_s1 + $0x8] sm:$0xff]  ;;  %v3394_v10 = vld [vmem:[%s165_s6 + $0x20] sm:$0xff]  ;;  %v198_v11 = vld [vmem:[%s5136_s1 + $0x10] sm:$0xff]  ;;  %s3742_s20 = scalar_lea.vmem [#allocation6], %s2987_s18  ;;  %s3240_s21 = smov 116  }
  0x3e   : > { %2988 = vmatmul.mubr.msk.f32.vlgmr.msra.gmra.mxu0 %vm200_vm0, %v196_v3  ;;  %2991 = vmatmul.mubr.msk.f32.vlgmr.msra.gmra.mxu1 %vm200_vm0, %v199_v4  ;;  %v961_v12 = vld [vmem:[%s5136_s1 + $0x20] sm:$0xff]  ;;  %v962_v13 = vld [vmem:[%s5136_s1 + $0x28] sm:$0xff]  ;;  %v963_v14 = vld [vmem:[%s5136_s1 + $0x30] sm:$0xff]  ;;  %s3241_s26 = smov 94   ;;  %s3242_s27 = smov 124  }
  0x3f   : > { %332 = vmatprep.subr.mxu1 %v192_v5  ;;  %366 = vmatprep.mubr.f32.mxu1 %v3236_v0  ;;  %v964_v15 = vld [vmem:[%s5136_s1 + $0x38] sm:$0xff]  ;;  %v1936_v16 = vld [vmem:[%s5136_s1 + $0x40] sm:$0xff]  ;;  %v1937_v17 = vld [vmem:[%s5136_s1 + $0x48] sm:$0xff]  ;;  %s3041_s29 = sshll.u32 %s3290_s2, 13  ;;  %s2909_s30 = sshll.u32 %s3742_s20, 4  ;;  %s5088_s30 = int_to_ptr.vmem [resolvable:$true] %s2909_s30 }
  0x40   : > { %333 = vmatpush1.msra.mxu1 %v3379_v6  ;;  %283 = vmatprep.mubr.f32.mxu0 %v3236_v0  ;;  %v1938_v18 = vld [vmem:[%s5136_s1 + $0x50] sm:$0xff]  ;;  %v1939_v19 = vld [vmem:[%s5136_s1 + $0x58] sm:$0xff]  ;;  %v3518_v20 = vstv %s188_s10  ;;  %s5086_s5 = scalar_lea.hbm %s5138_s3, %s3041_s29  ;;  %s2896_s2 = scalar_lea.sflag [#allocation5], %s3355_s28 }
  0x41   : > { %421 = vmatprep.subr.mxu0 %v3383_v7  ;;  %3057 = vmatprep.subr.mxu1 %v3385_v8  ;;  %s3169_s23 = scalar_lea.vmem %s5088_s30, 8192  ;;  %p5337_p12 = scmp.ne.s32.totalorder %s5212_s24, 0 }
  0x42   : > { %2992 = vmatmul.mubr.msk.f32.vlgmr.msra.gmra.mxu1 %vm200_vm0, %v196_v3  ;;  %2989 = vmatmul.mubr.msk.f32.gmra.mxu0 %vm200_vm0, %v197_v9  ;;  %p3170_p11 = scmp.ne.s32.totalorder %s5088_s30, %s3169_s23  ;;  %s3243_s7 = smov [#allocation6]  }
  0x43   : > { %372 = vmatprep.mubr.f32.mxu1 %v3236_v0  ;;  %289 = vmatprep.mubr.f32.mxu0 %v3236_v0  ;;  %s3173_s8 = sshll.u32 %s3243_s7, 4  ;;  %s3174_s8 = int_to_ptr.vmem [resolvable:$false] %s3173_s8 }
  0x44   : > { %422 = vmatpush1.msra.mxu0 %v3394_v10  ;;  %3058 = vmatpush3.msra.mxu1 %v3385_v8  ;;  %p3171_p13 = pnand %p3170_p11, %p5337_p12  ;;  %s3175_s9 = scalar_lea.vmem %s3174_s8, 16384 }
  0x45   : > { %1096 = vmatprep.subr.mxu0 %v192_v5  ;;  %1007 = vmatprep.subr.mxu1 %v3365_v1  ;;  %p3176_p1 = scmp.lt.s32.totalorder %s5088_s30, %s3174_s8  ;;  %p3177_p3 = scmp.lt.s32.totalorder %s3175_s9, %s3169_s23 }
  0x46   : > { %2993 = vmatmul.mubr.msk.f32.gmra.mxu1 %vm200_vm0, %v197_v9  ;;  %2990 = vmatmul.mubr.msk.f32.gmra.mxu0 %vm200_vm0, %v198_v11  ;;  %p3172_p0 = pneg %p3171_p13 }
  0x47   : > { %455 = vmatprep.mubr.f32.mxu0 %v3236_v0  ;;  %378 = vmatprep.mubr.f32.mxu1 %v3236_v0  ;;  %p3178_p8 = por %p3177_p3, %p3176_p1 }
  0x49   : > { %p3179_p10 = pnand %p3178_p8, %p3172_p0 }
  0x4a   : > { %2996 = vmatmul.mubr.msk.f32.vlgmr.msra.gmra.mxu0 %vm200_vm0, %v196_v3  ;;  %2994 = vmatmul.mubr.msk.f32.gmra.mxu1 %vm200_vm0, %v198_v11 }
  0x4b   : > { %461 = vmatprep.mubr.f32.mxu0 %v3236_v0  ;;  %384 = vmatprep.mubr.f32.mxu1 %v3236_v0 }
  0x4c   : > { %1097 = vmatpush1.msra.mxu0 %v3379_v6 }
  0x4d   : > { %3065 = vmatprep.subr.mxu0 %v3385_v8 }
  0x4e   : > { %2997 = vmatmul.mubr.msk.f32.gmra.mxu0 %vm200_vm0, %v197_v9  ;;  %2995 = vmatmul.mubr.msk.f32.gmra.mxu1 %vm200_vm0, %v199_v4 }
  0x4f   : > { %3059 = vmatprep.mubr.msk.f32.mxu1 %vm200_vm0, %v196_v3  ;;  %467 = vmatprep.mubr.f32.mxu0 %v3236_v0 }
  0x52   : > { %3060 = vmatmul.mubr.msk.f32.vlgmr.msra.gmra.mxu1 %vm200_vm0, %v197_v9  ;;  %2998 = vmatmul.mubr.msk.f32.gmra.mxu0 %vm200_vm0, %v198_v11 }
  0x53   : > { %473 = vmatprep.mubr.f32.mxu0 %v3236_v0  ;;  %3062 = vmatprep.mubr.msk.f32.mxu1 %vm200_vm0, %v198_v11 }
  0x54   : > { %1008 = vmatpush1.msra.mxu1 %v3367_v2 }
  0x55   : > { %1185 = vmatprep.subr.mxu1 %v3383_v7 }
  0x56   : > { %2999 = vmatmul.mubr.msk.f32.gmra.mxu0 %vm200_vm0, %v199_v4  ;;  %3063 = vmatmul.mubr.msk.f32.gmra.mxu1 %vm200_vm0, %v199_v4 }
  0x57   : > { %1130 = vmatprep.mubr.f32.mxu0 %v3236_v0  ;;  %1041 = vmatprep.mubr.f32.mxu1 %v3236_v0 }
  0x5a   : > { %3008 = vmatmul.mubr.msk.f32.vlgmr.msra.gmra.mxu0 %vm200_vm0, %v961_v12  ;;  %3004 = vmatmul.mubr.msk.f32.vlgmr.msra.gmra.mxu1 %vm200_vm0, %v961_v12 }
  0x5b   : > { %1047 = vmatprep.mubr.f32.mxu1 %v3236_v0  ;;  %1136 = vmatprep.mubr.f32.mxu0 %v3236_v0 }
  0x5c   : > { %3066 = vmatpush3.msra.mxu0 %v3385_v8  ;;  %1186 = vmatpush1.msra.mxu1 %v3394_v10 }
  0x5d   : > { %1982 = vmatprep.subr.mxu0 %v3365_v1  ;;  %2071 = vmatprep.subr.mxu1 %v192_v5 }
  0x5e   : > { %3005 = vmatmul.mubr.msk.f32.gmra.mxu1 %vm200_vm0, %v962_v13  ;;  %3009 = vmatmul.mubr.msk.f32.gmra.mxu0 %vm200_vm0, %v962_v13 }
  0x5f   : > { %1142 = vmatprep.mubr.f32.mxu0 %v3236_v0  ;;  %1053 = vmatprep.mubr.f32.mxu1 %v3236_v0 }
  0x62   : > { %3010 = vmatmul.mubr.msk.f32.gmra.mxu0 %vm200_vm0, %v963_v14  ;;  %3006 = vmatmul.mubr.msk.f32.gmra.mxu1 %vm200_vm0, %v963_v14 }
  0x63   : > { %1059 = vmatprep.mubr.f32.mxu1 %v3236_v0  ;;  %1148 = vmatprep.mubr.f32.mxu0 %v3236_v0 }
  0x66   : > { %3007 = vmatmul.mubr.msk.f32.gmra.mxu1 %vm200_vm0, %v964_v15  ;;  %3011 = vmatmul.mubr.msk.f32.gmra.mxu0 %vm200_vm0, %v964_v15 }
  0x67   : > { %3067 = vmatprep.mubr.msk.f32.mxu0 %vm200_vm0, %v961_v12  ;;  %1219 = vmatprep.mubr.f32.mxu1 %v3236_v0 }
  0x6a   : > { %3068 = vmatmul.mubr.msk.f32.vlgmr.msra.gmra.mxu0 %vm200_vm0, %v962_v13  ;;  %3012 = vmatmul.mubr.msk.f32.vlgmr.msra.gmra.mxu1 %vm200_vm0, %v961_v12 }
  0x6b   : > { %1225 = vmatprep.mubr.f32.mxu1 %v3236_v0  ;;  %3070 = vmatprep.mubr.msk.f32.mxu0 %vm200_vm0, %v963_v14 }
  0x6c   : > { %1983 = vmatpush1.msra.mxu0 %v3367_v2  ;;  %2072 = vmatpush1.msra.mxu1 %v3379_v6 }
  0x6d   : > { %2160 = vmatprep.subr.mxu0 %v3383_v7  ;;  %3073 = vmatprep.subr.mxu1 %v3385_v8 }
  0x6e   : > { %3013 = vmatmul.mubr.msk.f32.gmra.mxu1 %vm200_vm0, %v962_v13  ;;  %3071 = vmatmul.mubr.msk.f32.gmra.mxu0 %vm200_vm0, %v964_v15 }
  0x6f   : > { %1231 = vmatprep.mubr.f32.mxu1 %v3236_v0  ;;  %2016 = vmatprep.mubr.f32.mxu0 %v3236_v0 }
  0x72   : > { %3014 = vmatmul.mubr.msk.f32.gmra.mxu1 %vm200_vm0, %v963_v14  ;;  %3020 = vmatmul.mubr.msk.f32.vlgmr.msra.gmra.mxu0 %vm200_vm0, %v1936_v16 }
  0x73   : > { %1237 = vmatprep.mubr.f32.mxu1 %v3236_v0  ;;  %2022 = vmatprep.mubr.f32.mxu0 %v3236_v0 }
  0x74   : > { %2161 = vmatpush1.msra.mxu0 %v3394_v10 }
  0x76   : > { %3015 = vmatmul.mubr.msk.f32.gmra.mxu1 %vm200_vm0, %v964_v15  ;;  %3021 = vmatmul.mubr.msk.f32.gmra.mxu0 %vm200_vm0, %v1937_v17 }
  0x77   : > { %2105 = vmatprep.mubr.f32.mxu1 %v3236_v0  ;;  %2028 = vmatprep.mubr.f32.mxu0 %v3236_v0 }
  0x7a   : > { %3024 = vmatmul.mubr.msk.f32.vlgmr.msra.gmra.mxu1 %vm200_vm0, %v1936_v16  ;;  %3022 = vmatmul.mubr.msk.f32.gmra.mxu0 %vm200_vm0, %v1938_v18 }
  0x7b   : > { %2111 = vmatprep.mubr.f32.mxu1 %v3236_v0  ;;  %3074 = vmatpush3.msra.mxu1 %v3385_v8 }
  0x7c   : > { %2034 = vmatprep.mubr.f32.mxu0 %v3236_v0 }
  0x7e   : > { %3025 = vmatmul.mubr.msk.f32.gmra.mxu1 %vm200_vm0, %v1937_v17  ;;  %3023 = vmatmul.mubr.msk.f32.gmra.mxu0 %vm200_vm0, %v1939_v19 }
  0x7f   : > { %2117 = vmatprep.mubr.f32.mxu1 %v3236_v0  ;;  %2194 = vmatprep.mubr.f32.mxu0 %v3236_v0 }
  0x82   : > { %3026 = vmatmul.mubr.msk.f32.gmra.mxu1 %vm200_vm0, %v1938_v18  ;;  %3028 = vmatmul.mubr.msk.f32.vlgmr.msra.gmra.mxu0 %vm200_vm0, %v1936_v16 }
  0x83   : > { %2123 = vmatprep.mubr.f32.mxu1 %v3236_v0  ;;  %2200 = vmatprep.mubr.f32.mxu0 %v3236_v0 }
  0x86   : > { %3027 = vmatmul.mubr.msk.f32.gmra.mxu1 %vm200_vm0, %v1939_v19  ;;  %3029 = vmatmul.mubr.msk.f32.gmra.mxu0 %vm200_vm0, %v1937_v17 }
  0x87   : > { %3075 = vmatprep.mubr.msk.f32.mxu1 %vm200_vm0, %v1936_v16  ;;  %2206 = vmatprep.mubr.f32.mxu0 %v3236_v0 }
  0x8a   : > { %3076 = vmatmul.mubr.msk.f32.vlgmr.msra.gmra.mxu1 %vm200_vm0, %v1937_v17  ;;  %3030 = vmatmul.mubr.msk.f32.gmra.mxu0 %vm200_vm0, %v1938_v18 }
  0x8b   : > { %3078 = vmatprep.mubr.msk.f32.mxu1 %vm200_vm0, %v1938_v18  ;;  %2212 = vmatprep.mubr.f32.mxu0 %v3236_v0 }
  0x8e   : > { %3079 = vmatmul.mubr.msk.f32.gmra.mxu1 %vm200_vm0, %v1939_v19  ;;  %3031 = vmatmul.mubr.msk.f32.gmra.mxu0 %vm200_vm0, %v1939_v19 }
  0xfe   : > { %v279_v21 = vpop.f32.mrf.mxu0  ;;  %v297_v22 = vpop.f32.mrf.mxu1 }
  0xff   : > { %vm565_vm1 = vcmp.gt.f32.partialorder %v279_v21, 0.0  ;;  %v594_v23 = vmul.f32 %v3518_v20, %v279_v21  ;;  %vm586_vm2 = vcmp.gt.f32.partialorder %v297_v22, 0.0  ;;  %v615_v24 = vmul.f32 %v3518_v20, %v297_v22 }
 0x100   : > { %v281_v27 = vpop.f32.mrf.mxu0  ;;  %v299_v29 = vpop.f32.mrf.mxu1 }
 0x101   : > { %v3522_v25 = vsel %vm586_vm2, %v297_v22, %v615_v24  ;;  %v3524_v26 = vsel %vm565_vm1, %v279_v21, %v594_v23  ;;  %v595_v28 = vmul.f32 %v3518_v20, %v281_v27  ;;  %vm566_vm3 = vcmp.gt.f32.partialorder %v281_v27, 0.0 }
 0x102   : > { %720 = vrot.lane.b32.xlu1 %v3522_v25, %s3237_s11  ;;  %678 = vrot.lane.b32.xlu0 %v3524_v26, %s3237_s11  ;;  %v368_v30 = vpop.f32.mrf.mxu1  ;;  %v616_v31 = vmul.f32 %v3518_v20, %v299_v29  ;;  %vm587_vm4 = vcmp.gt.f32.partialorder %v299_v29, 0.0  ;;  %v285_v34 = vpop.f32.mrf.mxu0 }
 0x103   : > { %v596_v32 = vmul.f32 %v3518_v20, %v368_v30  ;;  %v3537_v33 = vsel %vm566_vm3, %v281_v27, %v595_v28  ;;  %vm567_vm5 = vcmp.gt.f32.partialorder %v368_v30, 0.0  ;;  %v601_v35 = vmul.f32 %v3518_v20, %v285_v34 }
 0x104   : > { %v3546_v37 = vsel %vm587_vm4, %v299_v29, %v616_v31  ;;  %vm572_vm6 = vcmp.gt.f32.partialorder %v285_v34, 0.0  ;;  %v370_v39 = vpop.f32.mrf.mxu1  ;;  %v287_v40 = vpop.f32.mrf.mxu0 }
 0x105   : > { %v3544_v36 = vsel %vm567_vm5, %v368_v30, %v596_v32  ;;  %v3552_v38 = vsel %vm572_vm6, %v285_v34, %v601_v35  ;;  %v597_v41 = vmul.f32 %v3518_v20, %v370_v39  ;;  %v602_v42 = vmul.f32 %v3518_v20, %v287_v40 }
 0x106   : > { %849 = vrot.lane.b32.xlu1 %v3522_v25, %s3238_s12  ;;  %807 = vrot.lane.b32.xlu0 %v3524_v26, %s3238_s12  ;;  %vm568_vm7 = vcmp.gt.f32.partialorder %v370_v39, 0.0  ;;  %vm573_vm8 = vcmp.gt.f32.partialorder %v287_v40, 0.0  ;;  %v291_v43 = vpop.f32.mrf.mxu0  ;;  %v374_v47 = vpop.f32.mrf.mxu1 }
 0x107   : > { %v3564_v44 = vsel %vm568_vm7, %v370_v39, %v597_v41  ;;  %v3566_v45 = vsel %vm573_vm8, %v287_v40, %v602_v42  ;;  %v608_v46 = vmul.f32 %v3518_v20, %v291_v43  ;;  %vm579_vm9 = vcmp.gt.f32.partialorder %v291_v43, 0.0 }
 0x108   : > { %v603_v48 = vmul.f32 %v3518_v20, %v374_v47  ;;  %vm574_vm10 = vcmp.gt.f32.partialorder %v374_v47, 0.0  ;;  %v376_v51 = vpop.f32.mrf.mxu1  ;;  %v293_v52 = vpop.f32.mrf.mxu0 }
 0x109   : > { %v3578_v49 = vsel %vm579_vm9, %v291_v43, %v608_v46  ;;  %v604_v53 = vmul.f32 %v3518_v20, %v376_v51  ;;  %v609_v54 = vmul.f32 %v3518_v20, %v293_v52  ;;  %vm575_vm11 = vcmp.gt.f32.partialorder %v376_v51, 0.0 }
 0x10a   : > { %809 = vrot.lane.b32.xlu1 %v3537_v33, %s3238_s12  ;;  %680 = vrot.lane.b32.xlu0 %v3537_v33, %s3237_s11  ;;  %v3580_v50 = vsel %vm574_vm10, %v374_v47, %v603_v48  ;;  %vm580_vm12 = vcmp.gt.f32.partialorder %v293_v52, 0.0  ;;  %v457_v55 = vpop.f32.mrf.mxu0  ;;  %v380_v59 = vpop.f32.mrf.mxu1 }
 0x10b   : > { %v3592_v56 = vsel %vm580_vm12, %v293_v52, %v609_v54  ;;  %v3594_v57 = vsel %vm575_vm11, %v376_v51, %v604_v53  ;;  %v598_v60 = vmul.f32 %v3518_v20, %v457_v55  ;;  %vm569_vm13 = vcmp.gt.f32.partialorder %v457_v55, 0.0 }
 0x10c   : > { %v459_v58 = vpop.f32.mrf.mxu0  ;;  %v382_v62 = vpop.f32.mrf.mxu1  ;;  %v610_v63 = vmul.f32 %v3518_v20, %v380_v59  ;;  %vm581_vm15 = vcmp.gt.f32.partialorder %v380_v59, 0.0 }
 0x10d   : > { %v599_v61 = vmul.f32 %v3518_v20, %v459_v58  ;;  %vm570_vm14 = vcmp.gt.f32.partialorder %v459_v58, 0.0  ;;  %v611_v0 = vmul.f32 %v3518_v20, %v382_v62  ;;  %v3610_v2 = vsel %vm569_vm13, %v457_v55, %v598_v60 }
 0x10e   : > { %682 = vrot.lane.b32.xlu1 %v3544_v36, %s3237_s11  ;;  %722 = vrot.lane.b32.xlu0 %v3546_v37, %s3237_s11  ;;  %vm582_vm0 = vcmp.gt.f32.partialorder %v382_v62, 0.0  ;;  %v3618_v4 = vsel %vm581_vm15, %v380_v59, %v610_v63  ;;  %v463_v5 = vpop.f32.mrf.mxu0  ;;  %v386_v7 = vpop.f32.mrf.mxu1  ;;  %vm734_vm13 = vcmask 605184   ;;  %vm941_vm15 = vcmask 949248  }
 0x10f   : > { %v3608_v1 = vsel %vm570_vm14, %v459_v58, %v599_v61  ;;  %v3616_v3 = vsel %vm582_vm0, %v382_v62, %v611_v0  ;;  %v605_v8 = vmul.f32 %v3518_v20, %v463_v5  ;;  %vm576_vm1 = vcmp.gt.f32.partialorder %v463_v5, 0.0 }
 0x110   : > { %v465_v6 = vpop.f32.mrf.mxu0  ;;  %v388_v10 = vpop.f32.mrf.mxu1  ;;  %v617_v11 = vmul.f32 %v3518_v20, %v386_v7  ;;  %vm588_vm3 = vcmp.gt.f32.partialorder %v386_v7, 0.0  ;;  %vm863_vm14 = vcmask 162816   ;;  %vm1725_vm0 = vcmask 326656  }
 0x111   : > { %v606_v9 = vmul.f32 %v3518_v20, %v465_v6  ;;  %vm577_vm2 = vcmp.gt.f32.partialorder %v465_v6, 0.0  ;;  %v618_v12 = vmul.f32 %v3518_v20, %v388_v10  ;;  %v3636_v13 = vsel %vm576_vm1, %v463_v5, %v605_v8 }
 0x112   : > { %692 = vrot.lane.b32.xlu1 %v3552_v38, %s3237_s11  ;;  %851 = vrot.lane.b32.xlu0 %v3546_v37, %s3238_s12  ;;  %vm589_vm4 = vcmp.gt.f32.partialorder %v388_v10, 0.0  ;;  %v3644_v15 = vsel %vm588_vm3, %v386_v7, %v617_v11  ;;  %v469_v17 = vpop.f32.mrf.mxu0  ;;  %v3061_v19 = vpop.f32.mrf.mxu1  ;;  %vm1910_vm1 = vcmask 1048480   ;;  %vm2712_vm3 = vcmask 769024  }
 0x113   : > { %v3638_v14 = vsel %vm577_vm2, %v465_v6, %v606_v9  ;;  %v3646_v16 = vsel %vm589_vm4, %v388_v10, %v618_v12  ;;  %v612_v18 = vmul.f32 %v3518_v20, %v469_v17  ;;  %vm583_vm5 = vcmp.gt.f32.partialorder %v469_v17, 0.0 }
 0x114   : > { %v607_v21 = vmul.f32 %v3061_v19, %v3518_v20  ;;  %vm578_vm6 = vcmp.gt.f32.partialorder %v3061_v19, 0.0  ;;  %v546_v24 = vpop.f32.mrf.mxu1  ;;  %v471_v27 = vpop.f32.mrf.mxu0  ;;  %vm1916_vm2 = vcmask 1014784   ;;  %vm2869_vm4 = vcmask 1048544  }
 0x115   : > { %v3662_v22 = vsel %vm583_vm5, %v469_v17, %v612_v18  ;;  %v600_v29 = vmul.f32 %v3518_v20, %v546_v24  ;;  %v613_v30 = vmul.f32 %v3518_v20, %v471_v27  ;;  %vm571_vm7 = vcmp.gt.f32.partialorder %v546_v24, 0.0 }
 0x116   : > { %821 = vrot.lane.b32.xlu1 %v3552_v38, %s3238_s12  ;;  %811 = vrot.lane.b32.xlu0 %v3544_v36, %s3238_s12  ;;  %v635_v23 = vsel %vm578_vm6, %v3061_v19, %v607_v21  ;;  %v3064_v28 = vpop.f32.mrf.mxu1  ;;  %vm584_vm8 = vcmp.gt.f32.partialorder %v471_v27, 0.0  ;;  %v475_v35 = vpop.f32.mrf.mxu0  ;;  %vm2875_vm5 = vcmask 195584  }
 0x117   : > { %v3672_v32 = vsel %vm584_vm8, %v471_v27, %v613_v30  ;;  %v628_v34 = vsel %vm571_vm7, %v546_v24, %v600_v29  ;;  %v619_v40 = vmul.f32 %v3518_v20, %v475_v35  ;;  %vm590_vm10 = vcmp.gt.f32.partialorder %v475_v35, 0.0 }
 0x118   : > { %v556_v31 = vpop.f32.mrf.mxu1  ;;  %v477_v41 = vpop.f32.mrf.mxu0  ;;  %v621_v46 = vmul.f32 %v3064_v28, %v3518_v20  ;;  %vm592_vm12 = vcmp.gt.f32.partialorder %v3064_v28, 0.0 }
 0x119   : > { %v614_v39 = vmul.f32 %v3518_v20, %v556_v31  ;;  %vm585_vm9 = vcmp.gt.f32.partialorder %v556_v31, 0.0  ;;  %v620_v43 = vmul.f32 %v3518_v20, %v477_v41  ;;  %v3684_v47 = vsel %vm590_vm10, %v475_v35, %v619_v40 }
 0x11a   : > { %684 = vrot.lane.b32.xlu1 %v3564_v44, %s3237_s11  ;;  %694 = vrot.lane.b32.xlu0 %v3566_v45, %s3237_s11  ;;  %vm591_vm11 = vcmp.gt.f32.partialorder %v477_v41, 0.0  ;;  %v649_v48 = vsel %vm592_vm12, %v3064_v28, %v621_v46  ;;  %v3697_v20 = vpop.f32.mrf.mxu1  ;;  %v1132_v52 = vpop.f32.mrf.mxu0 }
 0x11b   : > { %v642_v42 = vsel %vm585_vm9, %v556_v31, %v614_v39  ;;  %v3689_v51 = vsel %vm591_vm11, %v477_v41, %v620_v43  ;;  %v3699_v53 = vmax.f32 %v1132_v52, 0.0  ;;  %v5156_v54 = vmax.f32 %v3697_v20, 0.0 }
 0x11c   : > { %v1045_v55 = vpop.f32.mrf.mxu1  ;;  %v1134_v61 = vpop.f32.mrf.mxu0 }
 0x11d   : > { %v3710_v58 = vmax.f32 %v1045_v55, 0.0  ;;  %v3716_v62 = vmax.f32 %v1134_v61, 0.0 }
 0x11e   : > { %813 = vrot.lane.b32.xlu1 %v3564_v44, %s3238_s12  ;;  %823 = vrot.lane.b32.xlu0 %v3566_v45, %s3238_s12  ;;  %v3718_v5 = vpop.f32.mrf.mxu1  ;;  %v1138_v11 = vpop.f32.mrf.mxu0 }
 0x11f   : > { %v5155_v6 = vmax.f32 %v3718_v5, 0.0  ;;  %v3728_v17 = vmax.f32 %v1138_v11, 0.0 }
 0x120   : > { %v1051_v9 = vpop.f32.mrf.mxu1  ;;  %v1140_v27 = vpop.f32.mrf.mxu0 }
 0x121   : > { %v3736_v19 = vmax.f32 %v1051_v9, 0.0  ;;  %v3749_v28 = vmax.f32 %v1140_v27, 0.0 }
 0x122   : > { %696 = vrot.lane.b32.xlu1 %v3580_v50, %s3237_s11  ;;  %706 = vrot.lane.b32.xlu0 %v3578_v49, %s3237_s11  ;;  %v1144_v39 = vpop.f32.mrf.mxu0  ;;  %v3757_v40 = vpop.f32.mrf.mxu1 }
 0x124   : > { %v1057_v52 = vpop.f32.mrf.mxu1 }
 0x126   : > { %825 = vrot.lane.b32.xlu1 %v3580_v50, %s3238_s12  ;;  %835 = vrot.lane.b32.xlu0 %v3578_v49, %s3238_s12 }
 0x12a   : > { %708 = vrot.lane.b32.xlu1 %v3592_v56, %s3237_s11  ;;  %698 = vrot.lane.b32.xlu0 %v3594_v57, %s3237_s11 }
 0x12e   : > { %837 = vrot.lane.b32.xlu1 %v3592_v56, %s3238_s12  ;;  %827 = vrot.lane.b32.xlu0 %v3594_v57, %s3238_s12 }
 0x132   : > { %688 = vrot.lane.b32.xlu1 %v3608_v1, %s3237_s11  ;;  %686 = vrot.lane.b32.xlu0 %v3610_v2, %s3237_s11 }
 0x136   : > { %712 = vrot.lane.b32.xlu1 %v3616_v3, %s3237_s11  ;;  %710 = vrot.lane.b32.xlu0 %v3618_v4, %s3237_s11 }
 0x13a   : > { %817 = vrot.lane.b32.xlu1 %v3608_v1, %s3238_s12  ;;  %815 = vrot.lane.b32.xlu0 %v3610_v2, %s3238_s12 }
 0x13e   : > { %841 = vrot.lane.b32.xlu1 %v3616_v3, %s3238_s12  ;;  %839 = vrot.lane.b32.xlu0 %v3618_v4, %s3238_s12 }
 0x142   : > { %700 = vrot.lane.b32.xlu1 %v3636_v13, %s3237_s11  ;;  %702 = vrot.lane.b32.xlu0 %v3638_v14, %s3237_s11 }
 0x146   : > { %724 = vrot.lane.b32.xlu1 %v3644_v15, %s3237_s11  ;;  %726 = vrot.lane.b32.xlu0 %v3646_v16, %s3237_s11 }
 0x14a   : > { %829 = vrot.lane.b32.xlu1 %v3636_v13, %s3238_s12  ;;  %831 = vrot.lane.b32.xlu0 %v3638_v14, %s3238_s12 }
 0x14e   : > { %853 = vrot.lane.b32.xlu1 %v3644_v15, %s3238_s12  ;;  %855 = vrot.lane.b32.xlu0 %v3646_v16, %s3238_s12 }
 0x152   : > { %704 = vrot.lane.b32.xlu1 %v635_v23, %s3237_s11  ;;  %714 = vrot.lane.b32.xlu0 %v3662_v22, %s3237_s11 }
 0x156   : > { %833 = vrot.lane.b32.xlu1 %v635_v23, %s3238_s12  ;;  %843 = vrot.lane.b32.xlu0 %v3662_v22, %s3238_s12 }
 0x15a   : > { %716 = vrot.lane.b32.xlu1 %v3672_v32, %s3237_s11  ;;  %690 = vrot.lane.b32.xlu0 %v628_v34, %s3237_s11 }
 0x15e   : > { %845 = vrot.lane.b32.xlu1 %v3672_v32, %s3238_s12  ;;  %819 = vrot.lane.b32.xlu0 %v628_v34, %s3238_s12 }
 0x162   : > { %728 = vrot.lane.b32.xlu1 %v3684_v47, %s3237_s11  ;;  %718 = vrot.lane.b32.xlu0 %v642_v42, %s3237_s11 }
 0x166   : > { %732 = vrot.lane.b32.xlu1 %v649_v48, %s3237_s11  ;;  %730 = vrot.lane.b32.xlu0 %v3689_v51, %s3237_s11 }
 0x16a   : > { %857 = vrot.lane.b32.xlu1 %v3684_v47, %s3238_s12  ;;  %847 = vrot.lane.b32.xlu0 %v642_v42, %s3238_s12  ;;  %v3759_v42 = vmax.f32 %v1144_v39, 0.0 }
 0x16e   : > { %861 = vrot.lane.b32.xlu1 %v649_v48, %s3238_s12  ;;  %859 = vrot.lane.b32.xlu0 %v3689_v51, %s3238_s12 }
 0x172   : > { %1679 = vrot.lane.b32.xlu1 %v3699_v53, %s3239_s13  ;;  %1385 = vrot.lane.b32.xlu0 %v5156_v54, %s3237_s11 }
 0x174   : > { %v721_v59 = vpop.permute.xlu1 %720  ;;  %v679_v60 = vpop.permute.xlu0 %678 }
 0x176   : > { %1387 = vrot.lane.b32.xlu1 %v3710_v58, %s3237_s11  ;;  %1389 = vrot.lane.b32.xlu0 %v3699_v53, %s3237_s11 }
 0x178   : > { %v850_v63 = vpop.permute.xlu1 %849  ;;  %v808_v0 = vpop.permute.xlu0 %807 }
 0x17a   : > { %1391 = vrot.lane.b32.xlu1 %v3716_v62, %s3237_s11  ;;  %1677 = vrot.lane.b32.xlu0 %v3710_v58, %s3239_s13 }
 0x17c   : > { %v810_v7 = vpop.permute.xlu1 %809  ;;  %v681_v8 = vpop.permute.xlu0 %680 }
 0x17d   : > { %v735_v10 = vsel %vm734_vm13, %v679_v60, %v681_v8  ;;  %v864_v18 = vsel %vm863_vm14, %v808_v0, %v810_v7 }
 0x17e   : > { %v783_v12 = vmax.f32 %v3524_v26, %v735_v10  ;;  %1399 = vrot.lane.b32.xlu1 %v5155_v6, %s3237_s11  ;;  %1681 = vrot.lane.b32.xlu0 %v3716_v62, %s3239_s13 }
 0x180   : > { %v912_v21 = vmax.f32 %v783_v12, %v864_v18  ;;  %v683_v23 = vpop.permute.xlu1 %682  ;;  %v3738_v24 = vpop.permute.xlu0 %722 }
 0x181   : > { %v753_v26 = vsel %vm734_vm13, %v721_v59, %v3738_v24  ;;  %v736_v34 = vsel %vm734_vm13, %v681_v8, %v683_v23  ;;  %v3773_v59 = vmax.f32 %v1057_v52, 0.0 }
 0x182   : > { %936 = vst [vmem:[%s3742_s20] sm:$0xff] %v912_v21  ;;  %1403 = vrot.lane.b32.xlu1 %v3728_v17, %s3237_s11  ;;  %1401 = vrot.lane.b32.xlu0 %v3736_v19, %s3237_s11  ;;  %v801_v29 = vmax.f32 %v3522_v25, %v753_v26  ;;  %v784_v25 = vmax.f32 %v3537_v33, %v736_v34  ;;  %v1146_v33 = vpop.f32.mrf.mxu0 }
 0x183   : > { %v3785_v8 = vmax.f32 %v1146_v33, 0.0 }
 0x184   : > { %v693_v30 = vpop.permute.xlu1 %692  ;;  %v3752_v31 = vpop.permute.xlu0 %851 }
 0x185   : > { %v882_v35 = vsel %vm863_vm14, %v850_v63, %v3752_v31  ;;  %v1150_v34 = vpop.f32.mrf.mxu0 }
 0x186   : > { %v930_v41 = vmax.f32 %v801_v29, %v882_v35  ;;  %1691 = vrot.lane.b32.xlu1 %v3728_v17, %s3239_s13  ;;  %1405 = vrot.lane.b32.xlu0 %v3749_v28, %s3237_s11  ;;  %v3805_v35 = vmax.f32 %v1150_v34, 0.0 }
 0x188   : > { %955 = vst [vmem:[%s3742_s20 + $0x180] sm:$0xff] %v930_v41  ;;  %v822_v43 = vpop.permute.xlu1 %821  ;;  %v812_v46 = vpop.permute.xlu0 %811 }
 0x189   : > { %v865_v48 = vsel %vm863_vm14, %v810_v7, %v812_v46  ;;  %v5154_v7 = vmax.f32 %v3757_v40, 0.0 }
 0x18a   : > { %v913_v55 = vmax.f32 %v784_v25, %v865_v48  ;;  %1703 = vrot.lane.b32.xlu1 %v3759_v42, %s3239_s13  ;;  %1689 = vrot.lane.b32.xlu0 %v3736_v19, %s3239_s13  ;;  %v1152_v48 = vpop.f32.mrf.mxu0 }
 0x18c   : > { %937 = vst [vmem:[%s3742_s20 + $0x8] sm:$0xff] %v913_v55  ;;  %v3775_v60 = vpop.permute.xlu1 %684  ;;  %v695_v61 = vpop.permute.xlu0 %694 }
 0x18d   : > { %v737_v63 = vsel %vm734_vm13, %v683_v23, %v3775_v60  ;;  %v741_v0 = vsel %vm734_vm13, %v693_v30, %v695_v61  ;;  %v3794_v23 = vpop.f32.mrf.mxu1 }
 0x18e   : > { %1415 = vrot.lane.b32.xlu1 %v3773_v59, %s3237_s11  ;;  %1693 = vrot.lane.b32.xlu0 %v3749_v28, %s3239_s13  ;;  %v785_v9 = vmax.f32 %v3544_v36, %v737_v63  ;;  %v789_v10 = vmax.f32 %v3552_v38, %v741_v0  ;;  %v5153_v29 = vmax.f32 %v3794_v23, 0.0  ;;  %v3069_v63 = vpop.f32.mrf.mxu0 }
 0x18f   : > { %v3824_v0 = vmax.f32 %v3069_v63, 0.0 }
 0x190   : > { %v3789_v11 = vpop.permute.xlu1 %813  ;;  %v824_v12 = vpop.permute.xlu0 %823 }
 0x191   : > { %v866_v18 = vsel %vm863_vm14, %v812_v46, %v3789_v11  ;;  %v870_v21 = vsel %vm863_vm14, %v822_v43, %v824_v12 }
 0x192   : > { %v914_v27 = vmax.f32 %v785_v9, %v866_v18  ;;  %v918_v26 = vmax.f32 %v789_v10, %v870_v21  ;;  %1419 = vrot.lane.b32.xlu1 %v3785_v8, %s3237_s11  ;;  %1413 = vrot.lane.b32.xlu0 %v5154_v7, %s3237_s11 }
 0x194   : > { %938 = vst [vmem:[%s3742_s20 + $0x10] sm:$0xff] %v914_v27  ;;  %943 = vst [vmem:[%s3742_s20 + $0x80] sm:$0xff] %v918_v26  ;;  %v697_v36 = vpop.permute.xlu1 %696  ;;  %v707_v38 = vpop.permute.xlu0 %706 }
 0x195   : > { %v742_v30 = vsel %vm734_vm13, %v695_v61, %v697_v36  ;;  %v1063_v61 = vpop.f32.mrf.mxu1 }
 0x196   : > { %1427 = vrot.lane.b32.xlu1 %v5153_v29, %s3237_s11  ;;  %1417 = vrot.lane.b32.xlu0 %v3759_v42, %s3237_s11  ;;  %v790_v39 = vmax.f32 %v3566_v45, %v742_v30  ;;  %v3830_v9 = vmax.f32 %v1063_v61, 0.0 }
 0x198   : > { %v826_v41 = vpop.permute.xlu1 %825  ;;  %v836_v25 = vpop.permute.xlu0 %835 }
 0x199   : > { %v871_v43 = vsel %vm863_vm14, %v824_v12, %v826_v41 }
 0x19a   : > { %v919_v46 = vmax.f32 %v790_v39, %v871_v43  ;;  %1431 = vrot.lane.b32.xlu1 %v3805_v35, %s3237_s11  ;;  %1701 = vrot.lane.b32.xlu0 %v3773_v59, %s3239_s13 }
 0x19c   : > { %944 = vst [vmem:[%s3742_s20 + $0x88] sm:$0xff] %v919_v46  ;;  %v709_v52 = vpop.permute.xlu1 %708  ;;  %v3819_v55 = vpop.permute.xlu0 %698 }
 0x19d   : > { %v747_v33 = vsel %vm734_vm13, %v707_v38, %v709_v52  ;;  %v743_v45 = vsel %vm734_vm13, %v697_v36, %v3819_v55  ;;  %v1221_v36 = vpop.f32.mrf.mxu1 }
 0x19e   : > { %1715 = vrot.lane.b32.xlu1 %v3805_v35, %s3239_s13  ;;  %1705 = vrot.lane.b32.xlu0 %v3785_v8, %s3239_s13  ;;  %v795_v10 = vmax.f32 %v3578_v49, %v747_v33  ;;  %v791_v12 = vmax.f32 %v3580_v50, %v743_v45  ;;  %v3839_v34 = vmax.f32 %v1221_v36, 0.0  ;;  %v3845_v49 = vmax.f32 %v1152_v48, 0.0 }
 0x19f   : > { %v1223_v43 = vpop.f32.mrf.mxu1 }
 0x1a0   : > { %v838_v18 = vpop.permute.xlu1 %837  ;;  %v3834_v21 = vpop.permute.xlu0 %827  ;;  %v3865_v61 = vmax.f32 %v1223_v43, 0.0 }
 0x1a1   : > { %v876_v27 = vsel %vm863_vm14, %v836_v25, %v838_v18  ;;  %v872_v26 = vsel %vm863_vm14, %v826_v41, %v3834_v21 }
 0x1a2   : > { %v924_v38 = vmax.f32 %v795_v10, %v876_v27  ;;  %v920_v30 = vmax.f32 %v791_v12, %v872_v26  ;;  %1411 = vrot.lane.b32.xlu1 %v3824_v0, %s3237_s11  ;;  %1429 = vrot.lane.b32.xlu0 %v3830_v9, %s3237_s11  ;;  %v1310_v10 = vpop.f32.mrf.mxu0 }
 0x1a4   : > { %949 = vst [vmem:[%s3742_s20 + $0x100] sm:$0xff] %v924_v38  ;;  %945 = vst [vmem:[%s3742_s20 + $0x90] sm:$0xff] %v920_v30  ;;  %v3849_v50 = vpop.permute.xlu1 %688  ;;  %v687_v39 = vpop.permute.xlu0 %686 }
 0x1a5   : > { %v738_v46 = vsel %vm734_vm13, %v3775_v60, %v687_v39  ;;  %v739_v48 = vsel %vm734_vm13, %v687_v39, %v3849_v50 }
 0x1a6   : > { %1683 = vrot.lane.b32.xlu1 %v3839_v34, %s3239_s13  ;;  %1433 = vrot.lane.b32.xlu0 %v3845_v49, %s3237_s11  ;;  %v786_v33 = vmax.f32 %v3564_v44, %v738_v46  ;;  %v787_v45 = vmax.f32 %v3610_v2, %v739_v48  ;;  %v3882_v2 = vmax.f32 %v1310_v10, 0.0  ;;  %v1227_v46 = vpop.f32.mrf.mxu1 }
 0x1a8   : > { %v3855_v41 = vpop.permute.xlu1 %712  ;;  %v711_v25 = vpop.permute.xlu0 %710 }
 0x1a9   : > { %v748_v12 = vsel %vm734_vm13, %v709_v52, %v711_v25  ;;  %v749_v27 = vsel %vm734_vm13, %v711_v25, %v3855_v41 }
 0x1aa   : > { %1699 = vrot.lane.b32.xlu1 %v3824_v0, %s3239_s13  ;;  %1713 = vrot.lane.b32.xlu0 %v3830_v9, %s3239_s13  ;;  %v796_v52 = vmax.f32 %v3592_v56, %v748_v12  ;;  %v797_v30 = vmax.f32 %v3618_v4, %v749_v27  ;;  %v1229_v27 = vpop.f32.mrf.mxu1 }
 0x1ac   : > { %v3869_v63 = vpop.permute.xlu1 %817  ;;  %v816_v60 = vpop.permute.xlu0 %815 }
 0x1ad   : > { %v867_v26 = vsel %vm863_vm14, %v3789_v11, %v816_v60  ;;  %v868_v36 = vsel %vm863_vm14, %v816_v60, %v3869_v63  ;;  %v3072_v60 = vpop.f32.mrf.mxu0 }
 0x1ae   : > { %v915_v44 = vmax.f32 %v786_v33, %v867_v26  ;;  %v916_v38 = vmax.f32 %v787_v45, %v868_v36  ;;  %1395 = vrot.lane.b32.xlu1 %v3865_v61, %s3237_s11  ;;  %1717 = vrot.lane.b32.xlu0 %v3845_v49, %s3239_s13  ;;  %v3893_v45 = vmax.f32 %v1227_v46, 0.0 }
 0x1b0   : > { %939 = vst [vmem:[%s3742_s20 + $0x18] sm:$0xff] %v915_v44  ;;  %940 = vst [vmem:[%s3742_s20 + $0x20] sm:$0xff] %v916_v38  ;;  %v3888_v11 = vpop.permute.xlu1 %841  ;;  %v840_v39 = vpop.permute.xlu0 %839  ;;  %v3916_v44 = vmax.f32 %v1229_v27, 0.0 }
 0x1b1   : > { %v877_v25 = vsel %vm863_vm14, %v838_v18, %v840_v39  ;;  %v878_v43 = vsel %vm863_vm14, %v840_v39, %v3888_v11  ;;  %v3901_v18 = vmax.f32 %v3072_v60, 0.0 }
 0x1b2   : > { %v925_v48 = vmax.f32 %v796_v52, %v877_v25  ;;  %v926_v33 = vmax.f32 %v797_v30, %v878_v43  ;;  %1687 = vrot.lane.b32.xlu1 %v3882_v2, %s3239_s13  ;;  %1393 = vrot.lane.b32.xlu0 %v3839_v34, %s3237_s11  ;;  %v1320_v25 = vpop.f32.mrf.mxu0 }
 0x1b4   : > { %950 = vst [vmem:[%s3742_s20 + $0x108] sm:$0xff] %v925_v48  ;;  %951 = vst [vmem:[%s3742_s20 + $0x110] sm:$0xff] %v926_v33  ;;  %v701_v56 = vpop.permute.xlu1 %700  ;;  %v703_v4 = vpop.permute.xlu0 %702 }
 0x1b5   : > { %v744_v26 = vsel %vm734_vm13, %v3819_v55, %v701_v56  ;;  %v745_v36 = vsel %vm734_vm13, %v701_v56, %v703_v4 }
 0x1b6   : > { %1407 = vrot.lane.b32.xlu1 %v3893_v45, %s3237_s11  ;;  %1397 = vrot.lane.b32.xlu0 %v3882_v2, %s3237_s11  ;;  %v792_v38 = vmax.f32 %v3594_v57, %v744_v26  ;;  %v793_v52 = vmax.f32 %v3636_v13, %v745_v36  ;;  %v3931_v13 = vmax.f32 %v1320_v25, 0.0  ;;  %v3958_v25 = vpop.f32.mrf.mxu0 }
 0x1b8   : > { %v725_v10 = vpop.permute.xlu1 %724  ;;  %v3907_v12 = vpop.permute.xlu0 %726 }
 0x1b9   : > { %v754_v55 = vsel %vm734_vm13, %v3738_v24, %v725_v10  ;;  %v755_v43 = vsel %vm734_vm13, %v725_v10, %v3907_v12 }
 0x1ba   : > { %1439 = vrot.lane.b32.xlu1 %v3901_v18, %s3237_s11  ;;  %1685 = vrot.lane.b32.xlu0 %v3865_v61, %s3239_s13  ;;  %v802_v24 = vmax.f32 %v3546_v37, %v754_v55  ;;  %v803_v56 = vmax.f32 %v3644_v15, %v755_v43 }
 0x1bc   : > { %v830_v30 = vpop.permute.xlu1 %829  ;;  %v832_v39 = vpop.permute.xlu0 %831 }
 0x1bd   : > { %v873_v46 = vsel %vm863_vm14, %v3834_v21, %v830_v30  ;;  %v874_v48 = vsel %vm863_vm14, %v830_v30, %v832_v39 }
 0x1be   : > { %v921_v33 = vmax.f32 %v792_v38, %v873_v46  ;;  %v922_v57 = vmax.f32 %v793_v52, %v874_v48  ;;  %1695 = vrot.lane.b32.xlu1 %v3893_v45, %s3239_s13  ;;  %1409 = vrot.lane.b32.xlu0 %v3916_v44, %s3237_s11  ;;  %v1233_v52 = vpop.f32.mrf.mxu1 }
 0x1bf   : > { %v3952_v30 = vmax.f32 %v1233_v52, 0.0 }
 0x1c0   : > { %946 = vst [vmem:[%s3742_s20 + $0x98] sm:$0xff] %v921_v33  ;;  %947 = vst [vmem:[%s3742_s20 + $0xa0] sm:$0xff] %v922_v57  ;;  %v854_v21 = vpop.permute.xlu1 %853  ;;  %v3937_v60 = vpop.permute.xlu0 %855 }
 0x1c1   : > { %v883_v10 = vsel %vm863_vm14, %v3752_v31, %v854_v21  ;;  %v884_v27 = vsel %vm863_vm14, %v854_v21, %v3937_v60 }
 0x1c2   : > { %v931_v26 = vmax.f32 %v802_v24, %v883_v10  ;;  %v932_v36 = vmax.f32 %v803_v56, %v884_v27  ;;  %1723 = vrot.lane.b32.xlu1 %v3901_v18, %s3239_s13  ;;  %1425 = vrot.lane.b32.xlu0 %v3931_v13, %s3237_s11 }
 0x1c4   : > { %956 = vst [vmem:[%s3742_s20 + $0x188] sm:$0xff] %v931_v26  ;;  %957 = vst [vmem:[%s3742_s20 + $0x190] sm:$0xff] %v932_v36  ;;  %v705_v37 = vpop.permute.xlu1 %704  ;;  %v715_v15 = vpop.permute.xlu0 %714 }
 0x1c5   : > { %v746_v38 = vsel %vm734_vm13, %v703_v4, %v705_v37  ;;  %v750_v31 = vsel %vm734_vm13, %v3855_v41, %v715_v15  ;;  %v1235_v41 = vpop.f32.mrf.mxu1 }
 0x1c6   : > { %1711 = vrot.lane.b32.xlu1 %v3931_v13, %s3239_s13  ;;  %1697 = vrot.lane.b32.xlu0 %v3916_v44, %s3239_s13  ;;  %v794_v55 = vmax.f32 %v3638_v14, %v746_v38  ;;  %v798_v43 = vmax.f32 %v3616_v3, %v750_v31  ;;  %v5142_v3 = vmax.f32 %v3958_v25, 0.0  ;;  %v3970_v14 = vpop.f32.mrf.mxu0  ;;  %v3972_v21 = vmax.f32 %v1235_v41, 0.0 }
 0x1c7   : > { %v1239_v56 = vpop.f32.mrf.mxu1 }
 0x1c8   : > { %v834_v4 = vpop.permute.xlu1 %833  ;;  %v844_v46 = vpop.permute.xlu0 %843 }
 0x1c9   : > { %v875_v48 = vsel %vm863_vm14, %v832_v39, %v834_v4  ;;  %v879_v33 = vsel %vm863_vm14, %v3888_v11, %v844_v46  ;;  %v3980_v26 = vpop.f32.mrf.mxu0  ;;  %v1241_v36 = vpop.f32.mrf.mxu1 }
 0x1ca   : > { %v923_v57 = vmax.f32 %v794_v55, %v875_v48  ;;  %v927_v24 = vmax.f32 %v798_v43, %v879_v33  ;;  %1707 = vrot.lane.b32.xlu1 %v3952_v30, %s3239_s13  ;;  %1421 = vrot.lane.b32.xlu0 %v3952_v30, %s3237_s11  ;;  %v3995_v48 = vmax.f32 %v1239_v56, 0.0 }
 0x1cb   : > { %v3993_v43 = vpop.f32.mrf.mxu0  ;;  %v4013_v33 = vpop.f32.mrf.mxu1 }
 0x1cc   : > { %948 = vst.msk [vmem:[%s3742_s20 + $0xa8] sm:$0xff] %vm941_vm15, %v923_v57  ;;  %952 = vst [vmem:[%s3742_s20 + $0x118] sm:$0xff] %v927_v24  ;;  %v717_v39 = vpop.permute.xlu1 %716  ;;  %v691_v11 = vpop.permute.xlu0 %690 }
 0x1cd   : > { %v751_v10 = vsel %vm734_vm13, %v715_v15, %v717_v39  ;;  %v740_v27 = vsel %vm734_vm13, %v3849_v50, %v691_v11  ;;  %v5141_v15 = vmax.f32 %v3970_v14, 0.0 }
 0x1ce   : > { %1423 = vrot.lane.b32.xlu1 %v3972_v21, %s3237_s11  ;;  %2360 = vrot.lane.b32.xlu0 %v5142_v3, %s3237_s11  ;;  %v799_v37 = vmax.f32 %v3662_v22, %v751_v10  ;;  %v788_v38 = vmax.f32 %v3608_v1, %v740_v27  ;;  %v4002_v1 = vmax.f32 %v1241_v36, 0.0  ;;  %v4004_v22 = vpop.f32.mrf.mxu0  ;;  %v5152_v27 = vmax.f32 %v3980_v26, 0.0 }
 0x1cf   : > { %v5149_v36 = vmax.f32 %v4013_v33, 0.0 }
 0x1d0   : > { %v846_v31 = vpop.permute.xlu1 %845  ;;  %v820_v50 = vpop.permute.xlu0 %819 }
 0x1d1   : > { %v880_v52 = vsel %vm863_vm14, %v844_v46, %v846_v31  ;;  %v869_v55 = vsel %vm863_vm14, %v3869_v63, %v820_v50  ;;  %v4015_v57 = vpop.f32.mrf.mxu0 }
 0x1d2   : > { %v928_v4 = vmax.f32 %v799_v37, %v880_v52  ;;  %v917_v41 = vmax.f32 %v788_v38, %v869_v55  ;;  %2362 = vrot.lane.b32.xlu1 %v5141_v15, %s3237_s11  ;;  %1709 = vrot.lane.b32.xlu0 %v3972_v21, %s3239_s13  ;;  %v4026_v37 = vpop.f32.mrf.mxu1 }
 0x1d3   : > { %v4028_v38 = vpop.f32.mrf.mxu0 }
 0x1d4   : > { %953 = vst [vmem:[%s3742_s20 + $0x120] sm:$0xff] %v928_v4  ;;  %942 = vst.msk [vmem:[%s3742_s20 + $0x28] sm:$0xff] %vm941_vm15, %v917_v41  ;;  %v729_v63 = vpop.permute.xlu1 %728  ;;  %v719_v46 = vpop.permute.xlu0 %718 }
 0x1d5   : > { %v756_v11 = vsel %vm734_vm13, %v3907_v12, %v729_v63  ;;  %v752_v10 = vsel %vm734_vm13, %v717_v39, %v719_v46 }
 0x1d6   : > { %1435 = vrot.lane.b32.xlu1 %v3995_v48, %s3237_s11  ;;  %1437 = vrot.lane.b32.xlu0 %v4002_v1, %s3237_s11  ;;  %v804_v50 = vmax.f32 %v3646_v16, %v756_v11  ;;  %v800_v12 = vmax.f32 %v3672_v32, %v752_v10  ;;  %v5147_v16 = vmax.f32 %v4004_v22, 0.0  ;;  %v4044_v32 = vpop.f32.mrf.mxu1 }
 0x1d8   : > { %v733_v24 = vpop.permute.xlu1 %732  ;;  %v731_v56 = vpop.permute.xlu0 %730 }
 0x1d9   : > { %v757_v55 = vsel %vm734_vm13, %v729_v63, %v731_v56  ;;  %v758_v4 = vsel %vm734_vm13, %v731_v56, %v733_v24  ;;  %v4046_v63 = vpop.f32.mrf.mxu0  ;;  %v5148_v24 = vmax.f32 %v3993_v43, 0.0 }
 0x1da   : > { %1719 = vrot.lane.b32.xlu1 %v3995_v48, %s3239_s13  ;;  %1721 = vrot.lane.b32.xlu0 %v4002_v1, %s3239_s13  ;;  %5218 = vst [vmem:[#allocation9_spill] sm:$0xff] %v4046_v63  ;;  %v5162_v29 = vmax.f32 %v4046_v63, 0.0 }
 0x1dc   : > { %v858_v52 = vpop.permute.xlu1 %857  ;;  %v848_v39 = vpop.permute.xlu0 %847 }
 0x1dd   : > { %v885_v41 = vsel %vm863_vm14, %v3937_v60, %v858_v52  ;;  %v881_v46 = vsel %vm863_vm14, %v846_v31, %v848_v39  ;;  %v805_v60 = vmax.f32 %v3684_v47, %v757_v55  ;;  %v806_v31 = vmax.f32 %v3689_v51, %v758_v4  ;;  %v4065_v51 = vpop.f32.mrf.mxu0 }
 0x1de   : > { %v933_v15 = vmax.f32 %v804_v50, %v885_v41  ;;  %v929_v3 = vmax.f32 %v800_v12, %v881_v46  ;;  %2374 = vrot.lane.b32.xlu1 %v5152_v27, %s3237_s11  ;;  %2364 = vrot.lane.b32.xlu0 %v5149_v36, %s3237_s11  ;;  %v4056_v12 = vpop.f32.mrf.mxu1  ;;  %v5144_v47 = vmax.f32 %v4044_v32, 0.0  ;;  %v5146_v4 = vmax.f32 %v4065_v51, 0.0 }
 0x1df   : > { %5219 = vst [vmem:[#allocation10_spill] sm:$0xff] %v4056_v12  ;;  %v4084_v46 = vpop.f32.mrf.mxu0 }
 0x1e0   : > { %958 = vst [vmem:[%s3742_s20 + $0x198] sm:$0xff] %v933_v15  ;;  %954 = vst.msk [vmem:[%s3742_s20 + $0x128] sm:$0xff] %vm941_vm15, %v929_v3  ;;  %v862_v56 = vpop.permute.xlu1 %861  ;;  %v860_v11 = vpop.permute.xlu0 %859  ;;  %v5143_v3 = vmax.f32 %v4026_v37, 0.0  ;;  %v5167_v54 = vmax.f32 %v4084_v46, 0.0 }
 0x1e1   : > { %v886_v10 = vsel %vm863_vm14, %v858_v52, %v860_v11  ;;  %v887_v50 = vsel %vm863_vm14, %v860_v11, %v862_v56  ;;  %v4075_v55 = vpop.f32.mrf.mxu1  ;;  %5221 = vst [vmem:[#allocation12_spill] sm:$0xff] %v4084_v46 }
 0x1e2   : > { %v934_v39 = vmax.f32 %v805_v60, %v886_v10  ;;  %v935_v41 = vmax.f32 %v806_v31, %v887_v50  ;;  %2376 = vrot.lane.b32.xlu1 %v5148_v24, %s3237_s11  ;;  %2388 = vrot.lane.b32.xlu0 %v5147_v16, %s3237_s11  ;;  %v5145_v31 = vmax.f32 %v4015_v57, 0.0  ;;  %v5151_v10 = vmax.f32 %v4028_v38, 0.0 }
 0x1e3   : > { %v4086_v60 = vpop.f32.mrf.mxu1  ;;  %v5150_v50 = vmax.f32 %v4075_v55, 0.0  ;;  %v5158_v16 = vmax.f32 %v4056_v12, 0.0 }
 0x1e4   : > { %959 = vst [vmem:[%s3742_s20 + $0x1a0] sm:$0xff] %v934_v39  ;;  %960 = vst.msk [vmem:[%s3742_s20 + $0x1a8] sm:$0xff] %vm941_vm15, %v935_v41  ;;  %v4071_v15 = vpop.permute.xlu1 %1679  ;;  %v4073_v52 = vpop.permute.xlu0 %1385  ;;  %v5236_v46 = vmax.f32 %v4086_v60, 0.0 }
 0x1e5   : > { %5220 = vst [vmem:[#allocation11_spill] sm:$0xff] %v4071_v15  ;;  %5222 = vst [vmem:[#allocation13_spill] sm:$0xff] %v4086_v60  ;;  %v4101_v39 = vpop.f32.mrf.mxu0  ;;  %v4103_v41 = vpop.f32.mrf.mxu1 }
 0x1e6   : > { %2366 = vrot.lane.b32.xlu1 %v5143_v3, %s3237_s11  ;;  %2378 = vrot.lane.b32.xlu0 %v5144_v47, %s3237_s11  ;;  %5223 = vst [vmem:[#allocation14_spill] sm:$0xff] %v4101_v39  ;;  %5224 = vst [vmem:[#allocation15_spill] sm:$0xff] %v4103_v41 }
 0x1e7   : > { %v4132_v27 = vpop.f32.mrf.mxu0 }
 0x1e8   : > { %v4089_v56 = vpop.permute.xlu1 %1387  ;;  %v4091_v11 = vpop.permute.xlu0 %1389  ;;  %5229 = vst [vmem:[#allocation20_spill] sm:$0xff] %v4132_v27  ;;  %v5175_v15 = vmax.f32 %v4132_v27, 0.0 }
 0x1e9   : > { %v1441_v12 = vsel %vm734_vm13, %v4073_v52, %v4089_v56 }
 0x1ea   : > { %2390 = vrot.lane.b32.xlu1 %v5145_v31, %s3237_s11  ;;  %2368 = vrot.lane.b32.xlu0 %v5146_v4, %s3237_s11  ;;  %v5157_v31 = vmax.f32 %v4101_v39, 0.0  ;;  %v4116_v4 = vpop.f32.mrf.mxu1 }
 0x1eb   : > { %5226 = vst [vmem:[#allocation17_spill] sm:$0xff] %v4116_v4 }
 0x1ec   : > { %v4105_v3 = vpop.permute.xlu1 %1391  ;;  %v4107_v47 = vpop.permute.xlu0 %1677 }
 0x1ed   : > { %5225 = vst [vmem:[#allocation16_spill] sm:$0xff] %v4107_v47 }
 0x1ee   : > { %2402 = vrot.lane.b32.xlu1 %v5151_v10, %s3237_s11  ;;  %2392 = vrot.lane.b32.xlu0 %v5150_v50, %s3237_s11  ;;  %v5161_v50 = vmax.f32 %v4103_v41, 0.0  ;;  %v4130_v10 = vpop.f32.mrf.mxu1 }
 0x1ef   : > { %5228 = vst [vmem:[#allocation19_spill] sm:$0xff] %v4130_v10 }
 0x1f0   : > { %v4119_v24 = vpop.permute.xlu1 %1399  ;;  %v4121_v36 = vpop.permute.xlu0 %1681 }
 0x1f1   : > { %5227 = vst [vmem:[#allocation18_spill] sm:$0xff] %v4121_v36 }
 0x1f2   : > { %2380 = vrot.lane.b32.xlu1 %v5158_v16, %s3237_s11  ;;  %2382 = vrot.lane.b32.xlu0 %v5157_v31, %s3237_s11  ;;  %v5168_v31 = vmax.f32 %v4130_v10, 0.0  ;;  %v4145_v16 = vpop.f32.mrf.mxu0 }
 0x1f3   : > { %5230 = vst [vmem:[#allocation21_spill] sm:$0xff] %v4145_v16 }
 0x1f4   : > { %v4135_v7 = vpop.permute.xlu1 %1403  ;;  %v1402_v6 = vpop.permute.xlu0 %1401 }
 0x1f5   : > { %v4161_v41 = vpop.f32.mrf.mxu0 }
 0x1f6   : > { %2404 = vrot.lane.b32.xlu1 %v5162_v29, %s3237_s11  ;;  %2406 = vrot.lane.b32.xlu0 %v5161_v50, %s3237_s11  ;;  %v5172_v50 = vmax.f32 %v4145_v16, 0.0  ;;  %v4159_v29 = vpop.f32.mrf.mxu1  ;;  %5233 = vst [vmem:[#allocation24_spill] sm:$0xff] %v4161_v41  ;;  %v5186_v60 = vmax.f32 %v4161_v41, 0.0  ;;  %v1442_v41 = vsel %vm734_vm13, %v4089_v56, %v4091_v11  ;;  %v1443_v56 = vsel %vm734_vm13, %v4091_v11, %v4105_v3 }
 0x1f7   : > { %5232 = vst [vmem:[#allocation23_spill] sm:$0xff] %v4159_v29  ;;  %v1448_v11 = vsel %vm734_vm13, %v1402_v6, %v4135_v7 }
 0x1f8   : > { %v4147_v36 = vpop.permute.xlu1 %1691  ;;  %v4149_v47 = vpop.permute.xlu0 %1405 }
 0x1f9   : > { %5231 = vst [vmem:[#allocation22_spill] sm:$0xff] %v4147_v36 }
 0x1fa   : > { %2370 = vrot.lane.b32.xlu1 %v5167_v54, %s3237_s11  ;;  %2386 = vrot.lane.b32.xlu0 %v5168_v31, %s3237_s11  ;;  %v5176_v54 = vmax.f32 %v4159_v29, 0.0  ;;  %v4175_v31 = vpop.f32.mrf.mxu0 }
 0x1fb   : > { %5237 = vst [vmem:[#allocation27_spill] sm:$0xff] %v4175_v31 }
 0x1fc   : > { %v4163_v63 = vpop.permute.xlu1 %1703  ;;  %v4165_v36 = vpop.permute.xlu0 %1689 }
 0x1fd   : > { %5234 = vst [vmem:[#allocation25_spill] sm:$0xff] %v4163_v63  ;;  %5235 = vst [vmem:[#allocation26_spill] sm:$0xff] %v4165_v36  ;;  %v5180_v63 = vmax.f32 %v4116_v4, 0.0 }
 0x1fe   : > { %2394 = vrot.lane.b32.xlu1 %v5236_v46, %s3237_s11  ;;  %2396 = vrot.lane.b32.xlu0 %v5172_v50, %s3237_s11  ;;  %v5181_v46 = vmax.f32 %v4175_v31, 0.0  ;;  %v4187_v50 = vpop.f32.mrf.mxu1 }
 0x1ff   : > { %5239 = vst [vmem:[#allocation29_spill] sm:$0xff] %v4187_v50 }
 0x200   : > { %v1416_v10 = vpop.permute.xlu1 %1415  ;;  %v4177_v39 = vpop.permute.xlu0 %1693 }
 0x201   : > { %5238 = vst [vmem:[#allocation28_spill] sm:$0xff] %v4177_v39  ;;  %v4201_v39 = vpop.f32.mrf.mxu1 }
 0x202   : > { %2384 = vrot.lane.b32.xlu1 %v5175_v15, %s3237_s11  ;;  %2372 = vrot.lane.b32.xlu0 %v5176_v54, %s3237_s11  ;;  %v5187_v15 = vmax.f32 %v4187_v50, 0.0  ;;  %v4199_v54 = vpop.f32.mrf.mxu0 }
 0x204   : > { %v4189_v36 = vpop.permute.xlu1 %1419  ;;  %v1414_v16 = vpop.permute.xlu0 %1413 }
 0x206   : > { %2408 = vrot.lane.b32.xlu1 %v5180_v63, %s3237_s11  ;;  %2410 = vrot.lane.b32.xlu0 %v5181_v46, %s3237_s11  ;;  %v5189_v63 = vmax.f32 %v4199_v54, 0.0  ;;  %v5190_v46 = vmax.f32 %v4201_v39, 0.0 }
 0x208   : > { %v1428_v29 = vpop.permute.xlu1 %1427  ;;  %v1418_v27 = vpop.permute.xlu0 %1417 }
 0x20a   : > { %2398 = vrot.lane.b32.xlu1 %v5186_v60, %s3237_s11  ;;  %2414 = vrot.lane.b32.xlu0 %v5187_v15, %s3237_s11  ;;  %v5241_v60 = vmax.f32 %v3697_v20, 0.0  ;;  %v4246_v20 = vmax.f32 %v3699_v53, %v1443_v56  ;;  %v4264_v53 = vmax.f32 %v3736_v19, %v1448_v11  ;;  %v5244_v19 = vmax.f32 %v3757_v40, 0.0 }
 0x20c   : > { %v1432_v31 = vpop.permute.xlu1 %1431  ;;  %v4211_v4 = vpop.permute.xlu0 %1701  ;;  %v4227_v15 = vmax.f32 %v5241_v60, %v1441_v12 }
 0x20d   : > { %5240 = vst [vmem:[#allocation30_spill] sm:$0xff] %v4211_v4  ;;  %v4230_v4 = vmax.f32 %v3710_v58, %v1442_v41  ;;  %v5243_v58 = vmax.f32 %v3718_v5, 0.0 }
 0x20e   : > { %2412 = vrot.lane.b32.xlu1 %v5189_v63, %s3237_s11  ;;  %2400 = vrot.lane.b32.xlu0 %v5190_v46, %s3237_s11  ;;  %v1447_v63 = vsel %vm734_vm13, %v4119_v24, %v1402_v6  ;;  %v1449_v24 = vsel %vm734_vm13, %v4135_v7, %v4149_v47  ;;  %v1453_v6 = vsel %vm734_vm13, %v1414_v16, %v1416_v10 }
 0x20f   : > { %v4250_v12 = vmax.f32 %v5243_v58, %v1447_v63  ;;  %v4267_v5 = vmax.f32 %v3728_v17, %v1449_v24  ;;  %v1454_v7 = vsel %vm734_vm13, %v1416_v10, %v1418_v27  ;;  %v4281_v58 = vmax.f32 %v5244_v19, %v1453_v6 }
 0x210   : > { %v4232_v52 = vpop.permute.xlu1 %1715  ;;  %v4234_v50 = vpop.permute.xlu0 %1705  ;;  %v4284_v17 = vmax.f32 %v3773_v59, %v1454_v7  ;;  %v1455_v16 = vsel %vm734_vm13, %v1418_v27, %v4189_v36  ;;  %v5247_v59 = vmax.f32 %v3794_v23, 0.0 }
 0x211   : > { %5242 = vst [vmem:[#allocation31_spill] sm:$0xff] %v4232_v52  ;;  %v4298_v40 = vmax.f32 %v3759_v42, %v1455_v16  ;;  %v5275_v52 = vmax.f32 %v4065_v51, 0.0  ;;  %v5277_v51 = vmax.f32 %v4075_v55, 0.0 }
 0x212   : > { %1549 = vrot.lane.b32.xlu0 %v4227_v15, %s3238_s12  ;;  %1551 = vrot.lane.b32.xlu1 %v4230_v4, %s3238_s12 }
 0x213   : > { %5246 = vst [vmem:[#allocation33_spill] sm:$0xff] %v4298_v40 }
 0x214   : > { %v4252_v60 = vpop.permute.xlu1 %1411  ;;  %v1430_v41 = vpop.permute.xlu0 %1429 }
 0x215   : > { %v1459_v10 = vsel %vm734_vm13, %v1428_v29, %v1430_v41  ;;  %v1460_v27 = vsel %vm734_vm13, %v1430_v41, %v1432_v31 }
 0x216   : > { %1553 = vrot.lane.b32.xlu0 %v4246_v20, %s3238_s12  ;;  %1563 = vrot.lane.b32.xlu1 %v4250_v12, %s3238_s12  ;;  %v4302_v6 = vmax.f32 %v5247_v59, %v1459_v10  ;;  %v4314_v42 = vmax.f32 %v3830_v9, %v1460_v27 }
 0x218   : > { %v4269_v63 = vpop.permute.xlu1 %1683  ;;  %v4271_v56 = vpop.permute.xlu0 %1433  ;;  %5248 = vst [vmem:[#allocation34_spill] sm:$0xff] %v4302_v6  ;;  %5250 = vst [vmem:[#allocation36_spill] sm:$0xff] %v4314_v42 }
 0x219   : > { %v1461_v29 = vsel %vm734_vm13, %v1432_v31, %v4271_v56  ;;  %v1506_v31 = vmax.f32 %v3824_v0, %v4252_v60 }
 0x21a   : > { %1565 = vrot.lane.b32.xlu0 %v4264_v53, %s3238_s12  ;;  %1567 = vrot.lane.b32.xlu1 %v4267_v5, %s3238_s12  ;;  %v4317_v23 = vmax.f32 %v3805_v35, %v1461_v29 }
 0x21c   : > { %v4286_v11 = vpop.permute.xlu1 %1699  ;;  %v4288_v24 = vpop.permute.xlu0 %1713  ;;  %5251 = vst [vmem:[#allocation37_spill] sm:$0xff] %v4317_v23 }
 0x21d   : > { %5245 = vst [vmem:[#allocation32_spill] sm:$0xff] %v4288_v24 }
 0x21e   : > { %1577 = vrot.lane.b32.xlu0 %v4281_v58, %s3238_s12  ;;  %1579 = vrot.lane.b32.xlu1 %v4284_v17, %s3238_s12 }
 0x220   : > { %v1396_v7 = vpop.permute.xlu1 %1395  ;;  %v4304_v19 = vpop.permute.xlu0 %1717 }
 0x221   : > { %5249 = vst [vmem:[#allocation35_spill] sm:$0xff] %v4304_v19 }
 0x222   : > { %1581 = vrot.lane.b32.xlu0 %v4298_v40, %s3238_s12  ;;  %1591 = vrot.lane.b32.xlu1 %v4302_v6, %s3238_s12 }
 0x224   : > { %v4319_v16 = vpop.permute.xlu1 %1687  ;;  %v1394_v10 = vpop.permute.xlu0 %1393 }
 0x225   : > { %v1444_v9 = vsel %vm734_vm13, %v4105_v3, %v1394_v10  ;;  %v1445_v27 = vsel %vm734_vm13, %v1394_v10, %v1396_v7 }
 0x226   : > { %1593 = vrot.lane.b32.xlu0 %v4314_v42, %s3238_s12  ;;  %1595 = vrot.lane.b32.xlu1 %v4317_v23, %s3238_s12  ;;  %v4334_v29 = vmax.f32 %v3716_v62, %v1444_v9  ;;  %v4339_v0 = vmax.f32 %v3839_v34, %v1445_v27  ;;  %v5282_v42 = vld [vmem:[#allocation9_spill] sm:$0xff] }
 0x228   : > { %v1408_v41 = vpop.permute.xlu1 %1407  ;;  %v1398_v59 = vpop.permute.xlu0 %1397 }
 0x229   : > { %v1499_v35 = vmax.f32 %v3882_v2, %v1398_v59  ;;  %v1446_v19 = vsel %vm734_vm13, %v1396_v7, %v1398_v59  ;;  %v1450_v2 = vsel %vm734_vm13, %v4149_v47, %v1408_v41 }
 0x22a   : > { %1575 = vrot.lane.b32.xlu1 %v1506_v31, %s3238_s12  ;;  %v4349_v62 = vmax.f32 %v3865_v61, %v1446_v19  ;;  %v4354_v34 = vmax.f32 %v3749_v28, %v1450_v2 }
 0x22b   : > { %1561 = vrot.lane.b32.xlu0 %v1499_v35, %s3238_s12 }
 0x22c   : > { %v1440_v46 = vpop.permute.xlu1 %1439  ;;  %v4336_v23 = vpop.permute.xlu0 %1685 }
 0x22d   : > { %v1520_v47 = vmax.f32 %v3901_v18, %v1440_v46 }
 0x22e   : > { %1555 = vrot.lane.b32.xlu1 %v4334_v29, %s3238_s12 }
 0x22f   : > { %1557 = vrot.lane.b32.xlu0 %v4339_v0, %s3238_s12 }
 0x230   : > { %v4351_v3 = vpop.permute.xlu1 %1695  ;;  %v1410_v10 = vpop.permute.xlu0 %1409 }
 0x231   : > { %v1451_v61 = vsel %vm734_vm13, %v1408_v41, %v1410_v10  ;;  %v1452_v59 = vsel %vm734_vm13, %v1410_v10, %v4252_v60 }
 0x232   : > { %1559 = vrot.lane.b32.xlu1 %v4349_v62, %s3238_s12  ;;  %v4370_v28 = vmax.f32 %v3893_v45, %v1451_v61  ;;  %v4377_v35 = vmax.f32 %v3916_v44, %v1452_v59  ;;  %v5257_v59 = vmax.f32 %v3958_v25, 0.0 }
 0x233   : > { %1569 = vrot.lane.b32.xlu0 %v4354_v34, %s3238_s12 }
 0x234   : > { %v4361_v7 = vpop.permute.xlu1 %1723  ;;  %v1426_v31 = vpop.permute.xlu0 %1425 }
 0x235   : > { %5252 = vst [vmem:[#allocation38_spill] sm:$0xff] %v4361_v7  ;;  %v1513_v19 = vmax.f32 %v3931_v13, %v1426_v31  ;;  %v5292_v7 = vld [vmem:[#allocation23_spill] sm:$0xff] }
 0x236   : > { %1603 = vrot.lane.b32.xlu1 %v1520_v47, %s3238_s12 }
 0x237   : > { %1589 = vrot.lane.b32.xlu0 %v1513_v19, %s3238_s12 }
 0x238   : > { %v4372_v9 = vpop.permute.xlu1 %1711  ;;  %v4374_v18 = vpop.permute.xlu0 %1697 }
 0x239   : > { %5253 = vst [vmem:[#allocation39_spill] sm:$0xff] %v4372_v9 }
 0x23a   : > { %1571 = vrot.lane.b32.xlu1 %v4370_v28, %s3238_s12 }
 0x23b   : > { %1573 = vrot.lane.b32.xlu0 %v4377_v35, %s3238_s12 }
 0x23c   : > { %v4383_v13 = vpop.permute.xlu1 %1707  ;;  %v1422_v60 = vpop.permute.xlu0 %1421 }
 0x23d   : > { %5254 = vst [vmem:[#allocation40_spill] sm:$0xff] %v4383_v13  ;;  %v1456_v45 = vsel %vm734_vm13, %v4189_v36, %v1422_v60  ;;  %v5286_v13 = vld [vmem:[#allocation19_spill] sm:$0xff] }
 0x23e   : > { %v4388_v41 = vmax.f32 %v3785_v8, %v1456_v45 }
 0x240   : > { %5255 = vst [vmem:[#allocation41_spill] sm:$0xff] %v4388_v41  ;;  %v1424_v27 = vpop.permute.xlu1 %1423  ;;  %1583 = vrot.lane.b32.xlu1 %v4388_v41, %s3238_s12  ;;  %v2361_v44 = vpop.permute.xlu0 %2360 }
 0x241   : > { %v1457_v2 = vsel %vm734_vm13, %v1422_v60, %v1424_v27  ;;  %v1458_v10 = vsel %vm734_vm13, %v1424_v27, %v1426_v31 }
 0x242   : > { %v4395_v47 = vmax.f32 %v3952_v30, %v1457_v2  ;;  %v4398_v61 = vmax.f32 %v3972_v21, %v1458_v10 }
 0x244   : > { %v2363_v19 = vpop.permute.xlu1 %2362  ;;  %1585 = vrot.lane.b32.xlu0 %v4395_v47, %s3238_s12  ;;  %1587 = vrot.lane.b32.xlu1 %v4398_v61, %s3238_s12  ;;  %v4404_v8 = vpop.permute.xlu0 %1709 }
 0x245   : > { %5256 = vst [vmem:[#allocation42_spill] sm:$0xff] %v4404_v8  ;;  %v2416_v36 = vsel %vm734_vm13, %v2361_v44, %v2363_v19 }
 0x246   : > { %v4409_v31 = vmax.f32 %v5257_v59, %v2416_v36 }
 0x248   : > { %5258 = vst [vmem:[#allocation43_spill] sm:$0xff] %v4409_v31  ;;  %v1436_v30 = vpop.permute.xlu1 %1435  ;;  %2524 = vrot.lane.b32.xlu1 %v4409_v31, %s3238_s12  ;;  %v1438_v21 = vpop.permute.xlu0 %1437  ;;  %v5266_v31 = vmax.f32 %v3970_v14, 0.0  ;;  %v5268_v14 = vmax.f32 %v3993_v43, 0.0  ;;  %v5271_v43 = vmax.f32 %v4044_v32, 0.0 }
 0x249   : > { %v1462_v60 = vsel %vm734_vm13, %v4271_v56, %v1436_v30  ;;  %v1463_v45 = vsel %vm734_vm13, %v1436_v30, %v1438_v21  ;;  %v1464_v25 = vsel %vm734_vm13, %v1438_v21, %v1440_v46  ;;  %v5264_v30 = vmax.f32 %v3980_v26, 0.0 }
 0x24a   : > { %v4417_v27 = vmax.f32 %v3845_v49, %v1462_v60  ;;  %v4420_v2 = vmax.f32 %v3995_v48, %v1463_v45  ;;  %v4432_v56 = vmax.f32 %v4002_v1, %v1464_v25 }
 0x24c   : > { %5259 = vst [vmem:[#allocation44_spill] sm:$0xff] %v4417_v27  ;;  %5260 = vst [vmem:[#allocation45_spill] sm:$0xff] %v4420_v2  ;;  %v4423_v44 = vpop.permute.xlu1 %1719  ;;  %1597 = vrot.lane.b32.xlu0 %v4417_v27, %s3238_s12  ;;  %1599 = vrot.lane.b32.xlu1 %v4420_v2, %s3238_s12  ;;  %v4429_v10 = vpop.permute.xlu0 %1721  ;;  %v5267_v27 = vmax.f32 %v4013_v33, 0.0  ;;  %v5269_v33 = vmax.f32 %v4004_v22, 0.0 }
 0x24d   : > { %5261 = vst [vmem:[#allocation46_spill] sm:$0xff] %v4423_v44  ;;  %5262 = vst [vmem:[#allocation47_spill] sm:$0xff] %v4429_v10 }
 0x24e   : > { %5263 = vst [vmem:[#allocation48_spill] sm:$0xff] %v4432_v56 }
 0x250   : > { %v2375_v49 = vpop.permute.xlu1 %2374  ;;  %1601 = vrot.lane.b32.xlu0 %v4432_v56, %s3238_s12  ;;  %v2365_v48 = vpop.permute.xlu0 %2364 }
 0x251   : > { %v2417_v60 = vsel %vm734_vm13, %v2363_v19, %v2365_v48 }
 0x252   : > { %v4447_v44 = vmax.f32 %v5266_v31, %v2417_v60 }
 0x254   : > { %v2377_v36 = vpop.permute.xlu1 %2376  ;;  %v2389_v46 = vpop.permute.xlu0 %2388 }
 0x255   : > { %v2422_v59 = vsel %vm734_vm13, %v2375_v49, %v2377_v36 }
 0x256   : > { %v4439_v21 = vmax.f32 %v5264_v30, %v2422_v59 }
 0x258   : > { %5265 = vst [vmem:[#allocation49_spill] sm:$0xff] %v4439_v21  ;;  %v2367_v45 = vpop.permute.xlu1 %2366  ;;  %2538 = vrot.lane.b32.xlu0 %v4439_v21, %s3238_s12  ;;  %v2379_v1 = vpop.permute.xlu0 %2378 }
 0x259   : > { %v2418_v25 = vsel %vm734_vm13, %v2365_v48, %v2367_v45  ;;  %v2423_v26 = vsel %vm734_vm13, %v2377_v36, %v2379_v1 }
 0x25a   : > { %v4451_v49 = vmax.f32 %v5267_v27, %v2418_v25  ;;  %v4461_v31 = vmax.f32 %v5268_v14, %v2423_v26 }
 0x25c   : > { %v2391_v59 = vpop.permute.xlu1 %2390  ;;  %2528 = vrot.lane.b32.xlu1 %v4451_v49, %s3238_s12  ;;  %2526 = vrot.lane.b32.xlu0 %v4447_v44, %s3238_s12  ;;  %v2369_v19 = vpop.permute.xlu0 %2368 }
 0x25d   : > { %v2428_v48 = vsel %vm734_vm13, %v2389_v46, %v2391_v59  ;;  %v2419_v21 = vsel %vm734_vm13, %v2367_v45, %v2369_v19 }
 0x25e   : > { %v4465_v27 = vmax.f32 %v5269_v33, %v2428_v48  ;;  %v5272_v33 = vmax.f32 %v4028_v38, 0.0 }
 0x260   : > { %5270 = vst [vmem:[#allocation50_spill] sm:$0xff] %v4465_v27  ;;  %v2403_v30 = vpop.permute.xlu1 %2402  ;;  %2552 = vrot.lane.b32.xlu1 %v4465_v27, %s3238_s12  ;;  %2540 = vrot.lane.b32.xlu0 %v4461_v31, %s3238_s12  ;;  %v2393_v36 = vpop.permute.xlu0 %2392 }
 0x261   : > { %v2429_v38 = vsel %vm734_vm13, %v2391_v59, %v2393_v36 }
 0x264   : > { %v2381_v60 = vpop.permute.xlu1 %2380  ;;  %v2383_v25 = vpop.permute.xlu0 %2382 }
 0x265   : > { %v2424_v46 = vsel %vm734_vm13, %v2379_v1, %v2381_v60  ;;  %v2425_v59 = vsel %vm734_vm13, %v2381_v60, %v2383_v25 }
 0x266   : > { %v4474_v26 = vmax.f32 %v5271_v43, %v2424_v46  ;;  %v5274_v46 = vmax.f32 %v4026_v37, 0.0  ;;  %v5276_v37 = vmax.f32 %v4015_v57, 0.0 }
 0x268   : > { %v2405_v14 = vpop.permute.xlu1 %2404  ;;  %2542 = vrot.lane.b32.xlu1 %v4474_v26, %s3238_s12  ;;  %v2407_v22 = vpop.permute.xlu0 %2406  ;;  %v4489_v43 = vmax.f32 %v5274_v46, %v2419_v21  ;;  %v4503_v21 = vmax.f32 %v5276_v37, %v2429_v38  ;;  %v5278_v46 = vld [vmem:[#allocation10_spill] sm:$0xff] }
 0x269   : > { %v2434_v48 = vsel %vm734_vm13, %v2403_v30, %v2405_v14  ;;  %v5279_v57 = vmax.f32 %v5278_v46, 0.0  ;;  %v5280_v37 = vld [vmem:[#allocation14_spill] sm:$0xff]  ;;  %v2435_v60 = vsel %vm734_vm13, %v2405_v14, %v2407_v22  ;;  %v5283_v46 = vmax.f32 %v5282_v42, 0.0  ;;  %v5288_v42 = vld [vmem:[#allocation20_spill] sm:$0xff] }
 0x26a   : > { %v4481_v27 = vmax.f32 %v5272_v33, %v2434_v48  ;;  %v5281_v55 = vmax.f32 %v5280_v37, 0.0 }
 0x26b   : > { %v4517_v38 = vmax.f32 %v5279_v57, %v2425_v59  ;;  %v4531_v59 = vmax.f32 %v5283_v46, %v2435_v60  ;;  %v5284_v57 = vld [vmem:[#allocation15_spill] sm:$0xff]  ;;  %v5289_v60 = vmax.f32 %v5288_v42, 0.0 }
 0x26c   : > { %5273 = vst [vmem:[#allocation51_spill] sm:$0xff] %v4481_v27  ;;  %v2371_v24 = vpop.permute.xlu1 %2370  ;;  %2566 = vrot.lane.b32.xlu0 %v4481_v27, %s3238_s12  ;;  %v2387_v32 = vpop.permute.xlu0 %2386  ;;  %v5285_v37 = vmax.f32 %v5284_v57, 0.0 }
 0x26d   : > { %v2420_v1 = vsel %vm734_vm13, %v2369_v19, %v2371_v24 }
 0x26e   : > { %v4493_v30 = vmax.f32 %v5275_v52, %v2420_v1 }
 0x270   : > { %v2395_v48 = vpop.permute.xlu1 %2394  ;;  %2532 = vrot.lane.b32.xlu1 %v4493_v30, %s3238_s12  ;;  %2530 = vrot.lane.b32.xlu0 %v4489_v43, %s3238_s12  ;;  %v2397_v45 = vpop.permute.xlu0 %2396 }
 0x271   : > { %v2430_v19 = vsel %vm734_vm13, %v2393_v36, %v2395_v48 }
 0x272   : > { %v4507_v52 = vmax.f32 %v5277_v51, %v2430_v19 }
 0x274   : > { %v2385_v33 = vpop.permute.xlu1 %2384  ;;  %2556 = vrot.lane.b32.xlu1 %v4507_v52, %s3238_s12  ;;  %2554 = vrot.lane.b32.xlu0 %v4503_v21, %s3238_s12  ;;  %v2373_v1 = vpop.permute.xlu0 %2372 }
 0x275   : > { %v2426_v36 = vsel %vm734_vm13, %v2383_v25, %v2385_v33  ;;  %v2427_v14 = vsel %vm734_vm13, %v2385_v33, %v2387_v32 }
 0x276   : > { %v4521_v19 = vmax.f32 %v5281_v55, %v2426_v36  ;;  %v4546_v46 = vmax.f32 %v5289_v60, %v2427_v14 }
 0x278   : > { %v2409_v51 = vpop.permute.xlu1 %2408  ;;  %2546 = vrot.lane.b32.xlu1 %v4521_v19, %s3238_s12  ;;  %2544 = vrot.lane.b32.xlu0 %v4517_v38, %s3238_s12  ;;  %v2411_v27 = vpop.permute.xlu0 %2410 }
 0x279   : > { %v2436_v25 = vsel %vm734_vm13, %v2407_v22, %v2409_v51  ;;  %v5287_v22 = vmax.f32 %v5286_v13, 0.0  ;;  %v5293_v13 = vmax.f32 %v5292_v7, 0.0  ;;  %v2437_v7 = vsel %vm734_vm13, %v2409_v51, %v2411_v27 }
 0x27a   : > { %v4535_v36 = vmax.f32 %v5285_v37, %v2436_v25  ;;  %v2431_v25 = vsel %vm734_vm13, %v2395_v48, %v2397_v45  ;;  %v5290_v37 = vld [vmem:[#allocation13_spill] sm:$0xff]  ;;  %v5294_v48 = vld [vmem:[#allocation12_spill] sm:$0xff] }
 0x27b   : > { %v2481_v41 = vmax.f32 %v5287_v22, %v2387_v32  ;;  %v5291_v40 = vmax.f32 %v5290_v37, 0.0  ;;  %v2474_v32 = vmax.f32 %v5293_v13, %v2373_v1  ;;  %v2421_v22 = vsel %vm734_vm13, %v2371_v24, %v2373_v1  ;;  %v5298_v1 = vld [vmem:[#allocation17_spill] sm:$0xff] }
 0x27c   : > { %v2399_v55 = vpop.permute.xlu1 %2398  ;;  %2570 = vrot.lane.b32.xlu1 %v4535_v36, %s3238_s12  ;;  %2568 = vrot.lane.b32.xlu0 %v4531_v59, %s3238_s12  ;;  %v2415_v6 = vpop.permute.xlu0 %2414  ;;  %v5295_v60 = vmax.f32 %v5294_v48, 0.0  ;;  %v5299_v13 = vmax.f32 %v5298_v1, 0.0  ;;  %v5304_v1 = vmax.f32 %v4201_v39, 0.0  ;;  %v5305_v39 = vld [vmem:[#allocation27_spill] sm:$0xff] }
 0x27d   : > { %v4554_v10 = vmax.f32 %v5291_v40, %v2431_v25  ;;  %v2432_v14 = vsel %vm734_vm13, %v2397_v45, %v2399_v55  ;;  %v5296_v40 = vld [vmem:[#allocation21_spill] sm:$0xff] }
 0x27e   : > { %v4565_v56 = vmax.f32 %v5295_v60, %v2421_v22  ;;  %v5297_v25 = vmax.f32 %v5296_v40, 0.0  ;;  %v5300_v22 = vld [vmem:[#allocation29_spill] sm:$0xff] }
 0x27f   : > { %v5301_v48 = vmax.f32 %v5300_v22, 0.0 }
 0x280   : > { %v2413_v57 = vpop.permute.xlu1 %2412  ;;  %2550 = vrot.lane.b32.xlu1 %v2481_v41, %s3238_s12  ;;  %2548 = vrot.lane.b32.xlu0 %v4546_v46, %s3238_s12  ;;  %v2401_v33 = vpop.permute.xlu0 %2400  ;;  %v4569_v37 = vmax.f32 %v5297_v25, %v2432_v14  ;;  %v5302_v25 = vld [vmem:[#allocation24_spill] sm:$0xff] }
 0x281   : > { %v2495_v60 = vmax.f32 %v5301_v48, %v2415_v6  ;;  %v2433_v14 = vsel %vm734_vm13, %v2399_v55, %v2401_v33  ;;  %v5303_v2 = vmax.f32 %v5302_v25, 0.0  ;;  %v2439_v22 = vsel %vm734_vm13, %v2413_v57, %v2415_v6 }
 0x282   : > { %v5307_v6 = vmax.f32 %v4199_v54, 0.0  ;;  %v5308_v54 = vld [vmem:[#allocation11_spill] sm:$0xff] }
 0x283   : > { %v4588_v8 = vmax.f32 %v5303_v2, %v2433_v14 }
 0x284   : > { %v1552_v42 = vpop.permute.xlu1 %1551  ;;  %2558 = vrot.lane.b32.xlu0 %v4554_v10, %s3238_s12  ;;  %2536 = vrot.lane.b32.xlu1 %v2474_v32, %s3238_s12  ;;  %v1550_v41 = vpop.permute.xlu0 %1549  ;;  %v4578_v32 = vmax.f32 %v5299_v13, %v2437_v7  ;;  %v2488_v7 = vmax.f32 %v5304_v1, %v2401_v33  ;;  %v2438_v13 = vsel %vm734_vm13, %v2411_v27, %v2413_v57  ;;  %v5306_v33 = vmax.f32 %v5305_v39, 0.0 }
 0x285   : > { %v1605_v55 = vsel %vm863_vm14, %v1550_v41, %v1552_v42  ;;  %v4609_v27 = vmax.f32 %v5307_v6, %v2439_v22  ;;  %v5312_v6 = vld [vmem:[#allocation26_spill] sm:$0xff] }
 0x286   : > { %v1653_v57 = vmax.f32 %v4227_v15, %v1605_v55 }
 0x288   : > { %v1564_v24 = vpop.permute.xlu1 %1563  ;;  %2560 = vrot.lane.b32.xlu1 %v4569_v37, %s3238_s12  ;;  %2534 = vrot.lane.b32.xlu0 %v4565_v56, %s3238_s12  ;;  %v1554_v45 = vpop.permute.xlu0 %1553 }
 0x289   : > { %v1606_v48 = vsel %vm863_vm14, %v1552_v42, %v1554_v45 }
 0x28a   : > { %v1654_v42 = vmax.f32 %v4230_v4, %v1606_v48 }
 0x28c   : > { %v1568_v40 = vpop.permute.xlu1 %1567  ;;  %2572 = vrot.lane.b32.xlu0 %v4578_v32, %s3238_s12  ;;  %2578 = vrot.lane.b32.xlu1 %v2495_v60, %s3238_s12  ;;  %v1566_v51 = vpop.permute.xlu0 %1565  ;;  %v4605_v60 = vmax.f32 %v5306_v33, %v2438_v13  ;;  %v5310_v13 = vld [vmem:[#allocation18_spill] sm:$0xff] }
 0x28d   : > { %v1611_v41 = vsel %vm863_vm14, %v1564_v24, %v1566_v51  ;;  %v1612_v14 = vsel %vm863_vm14, %v1566_v51, %v1568_v40  ;;  %v1727_v4 = vsel %vm1725_vm0, %v5308_v54, %v5310_v13  ;;  %v5311_v33 = vld [vmem:[#allocation22_spill] sm:$0xff] }
 0x28e   : > { %v1771_v51 = vmax.f32 %v1654_v42, %v1727_v4  ;;  %v1659_v22 = vmax.f32 %v4250_v12, %v1611_v41  ;;  %v1660_v55 = vmax.f32 %v4264_v53, %v1612_v14 }
 0x290   : > { %v4596_v9 = vpop.permute.xlu1 %1579  ;;  %2564 = vrot.lane.b32.xlu1 %v2488_v7, %s3238_s12  ;;  %2562 = vrot.lane.b32.xlu0 %v4588_v8, %s3238_s12  ;;  %v4601_v2 = vpop.permute.xlu0 %1577  ;;  %v5309_v7 = vld [vmem:[#allocation16_spill] sm:$0xff] }
 0x291   : > { %v1726_v15 = vsel %vm1725_vm0, %v5309_v7, %v5308_v54  ;;  %v1731_v7 = vsel %vm1725_vm0, %v5312_v6, %v5311_v33  ;;  %v5313_v54 = vld [vmem:[#allocation28_spill] sm:$0xff] }
 0x292   : > { %v1770_v24 = vmax.f32 %v1653_v57, %v1726_v15  ;;  %v1732_v57 = vsel %vm1725_vm0, %v5311_v33, %v5313_v54  ;;  %v1776_v12 = vmax.f32 %v1659_v22, %v1731_v7  ;;  %v1728_v33 = vsel %vm1725_vm0, %v5310_v13, %v4269_v63 }
 0x293   : > { %v1777_v42 = vmax.f32 %v1660_v55, %v1732_v57  ;;  %v1729_v55 = vsel %vm1725_vm0, %v4269_v63, %v4336_v23  ;;  %v1730_v63 = vsel %vm1725_vm0, %v4336_v23, %v4319_v16 }
 0x294   : > { %v4615_v25 = vpop.permute.xlu1 %1591  ;;  %2574 = vrot.lane.b32.xlu1 %v4605_v60, %s3238_s12  ;;  %2576 = vrot.lane.b32.xlu0 %v4609_v27, %s3238_s12  ;;  %v4621_v1 = vpop.permute.xlu0 %1581 }
 0x298   : > { %v4631_v48 = vpop.permute.xlu1 %1595  ;;  %1818 = vrot.lane.b32.xlu0 %v1770_v24, %s3240_s21  ;;  %1820 = vrot.lane.b32.xlu1 %v1771_v51, %s3240_s21  ;;  %v4635_v39 = vpop.permute.xlu0 %1593 }
 0x29c   : > { %v1576_v53 = vpop.permute.xlu1 %1575  ;;  %1832 = vrot.lane.b32.xlu1 %v1777_v42, %s3240_s21  ;;  %1830 = vrot.lane.b32.xlu0 %v1776_v12, %s3240_s21 }
 0x29d   : > { %v1562_v41 = vpop.permute.xlu0 %1561 }
 0x2a0   : > { %v1556_v14 = vpop.permute.xlu1 %1555 }
 0x2a1   : > { %v1607_v15 = vsel %vm863_vm14, %v1554_v45, %v1556_v14  ;;  %v1558_v4 = vpop.permute.xlu0 %1557 }
 0x2a2   : > { %v1655_v24 = vmax.f32 %v4246_v20, %v1607_v15  ;;  %v1608_v51 = vsel %vm863_vm14, %v1556_v14, %v1558_v4 }
 0x2a3   : > { %v1656_v22 = vmax.f32 %v4334_v29, %v1608_v51 }
 0x2a4   : > { %v1772_v6 = vmax.f32 %v1655_v24, %v1728_v33  ;;  %v1560_v7 = vpop.permute.xlu1 %1559 }
 0x2a5   : > { %v1773_v57 = vmax.f32 %v1656_v22, %v1729_v55  ;;  %v1609_v45 = vsel %vm863_vm14, %v1558_v4, %v1560_v7  ;;  %v1610_v12 = vsel %vm863_vm14, %v1560_v7, %v1562_v41  ;;  %v1570_v20 = vpop.permute.xlu0 %1569  ;;  %v1734_v22 = vsel %vm1725_vm0, %v4351_v3, %v4374_v18 }
 0x2a6   : > { %v1657_v42 = vmax.f32 %v4339_v0, %v1609_v45  ;;  %v1658_v14 = vmax.f32 %v4349_v62, %v1610_v12  ;;  %v1613_v13 = vsel %vm863_vm14, %v1568_v40, %v1570_v20  ;;  %1822 = vrot.lane.b32.xlu0 %v1772_v6, %s3240_s21  ;;  %v1733_v62 = vsel %vm1725_vm0, %v5313_v54, %v4351_v3 }
 0x2a7   : > { %1824 = vrot.lane.b32.xlu1 %v1773_v57, %s3240_s21  ;;  %v1661_v41 = vmax.f32 %v4267_v5, %v1613_v13  ;;  %v1735_v55 = vsel %vm1725_vm0, %v4374_v18, %v4286_v11 }
 0x2a8   : > { %v1774_v29 = vmax.f32 %v1657_v42, %v1730_v63  ;;  %v1775_v15 = vmax.f32 %v1658_v14, %v4319_v16  ;;  %v4667_v4 = vpop.permute.xlu1 %1603 }
 0x2a9   : > { %v4669_v0 = vpop.permute.xlu0 %1589  ;;  %v1778_v23 = vmax.f32 %v1661_v41, %v1733_v62 }
 0x2aa   : > { %1826 = vrot.lane.b32.xlu0 %v1774_v29, %s3240_s21 }
 0x2ab   : > { %1828 = vrot.lane.b32.xlu1 %v1775_v15, %s3240_s21 }
 0x2ac   : > { %v1572_v40 = vpop.permute.xlu1 %1571 }
 0x2ad   : > { %v1614_v24 = vsel %vm863_vm14, %v1570_v20, %v1572_v40  ;;  %v1574_v51 = vpop.permute.xlu0 %1573 }
 0x2ae   : > { %v1662_v16 = vmax.f32 %v4354_v34, %v1614_v24  ;;  %v1615_v5 = vsel %vm863_vm14, %v1572_v40, %v1574_v51  ;;  %v1616_v33 = vsel %vm863_vm14, %v1574_v51, %v1576_v53  ;;  %1834 = vrot.lane.b32.xlu0 %v1778_v23, %s3240_s21 }
 0x2af   : > { %v1663_v54 = vmax.f32 %v4370_v28, %v1615_v5  ;;  %v1664_v7 = vmax.f32 %v4377_v35, %v1616_v33 }
 0x2b0   : > { %v1779_v6 = vmax.f32 %v1662_v16, %v1734_v22 }
 0x2b1   : > { %v1780_v34 = vmax.f32 %v1663_v54, %v1735_v55  ;;  %v1781_v53 = vmax.f32 %v1664_v7, %v4286_v11 }
 0x2b2   : > { %v4689_v57 = vpop.permute.xlu1 %1583  ;;  %1836 = vrot.lane.b32.xlu1 %v1779_v6, %s3240_s21 }
 0x2b3   : > { %1838 = vrot.lane.b32.xlu0 %v1780_v34, %s3240_s21 }
 0x2b6   : > { %v4694_v45 = vpop.permute.xlu1 %1587  ;;  %1840 = vrot.lane.b32.xlu1 %v1781_v53, %s3240_s21  ;;  %v1586_v3 = vpop.permute.xlu0 %1585 }
 0x2b7   : > { %v4699_v28 = vsel %vm863_vm14, %v4689_v57, %v1586_v3  ;;  %v4703_v18 = vsel %vm863_vm14, %v1586_v3, %v4694_v45 }
 0x2ba   : > { %v2525_v35 = vpop.permute.xlu1 %2524 }
 0x2be   : > { %v1600_v12 = vpop.permute.xlu1 %1599  ;;  %v4705_v20 = vpop.permute.xlu0 %1597 }
 0x2bf   : > { %v4709_v11 = vsel %vm863_vm14, %v4705_v20, %v1600_v12 }
 0x2c2   : > { %v4711_v42 = vpop.permute.xlu0 %1601 }
 0x2c3   : > { %v4715_v14 = vsel %vm863_vm14, %v1600_v12, %v4711_v42 }
 0x2ca   : > { %v2539_v13 = vpop.permute.xlu0 %2538 }
 0x2ce   : > { %v2529_v63 = vpop.permute.xlu1 %2528  ;;  %v2527_v29 = vpop.permute.xlu0 %2526 }
 0x2cf   : > { %v4718_v15 = vsel %vm863_vm14, %v2525_v35, %v2527_v29  ;;  %v2581_v41 = vsel %vm863_vm14, %v2527_v29, %v2529_v63 }
 0x2d0   : > { %v4722_v62 = vmax.f32 %v4447_v44, %v2581_v41 }
 0x2d2   : > { %2672 = vrot.lane.b32.xlu1 %v4722_v62, %s3241_s26  ;;  %v2541_v23 = vpop.permute.xlu0 %2540  ;;  %v2553_v24 = vpop.permute.xlu1 %2552 }
 0x2d3   : > { %v4727_v40 = vsel %vm863_vm14, %v2539_v13, %v2541_v23 }
 0x2da   : > { %v2543_v51 = vpop.permute.xlu1 %2542 }
 0x2db   : > { %v2587_v16 = vsel %vm863_vm14, %v2541_v23, %v2543_v51 }
 0x2dc   : > { %v4731_v5 = vmax.f32 %v4461_v31, %v2587_v16 }
 0x2de   : > { %2682 = vrot.lane.b32.xlu0 %v4731_v5, %s3241_s26  ;;  %v2567_v44 = vpop.permute.xlu0 %2566 }
 0x2e2   : > { %v2533_v33 = vpop.permute.xlu1 %2532  ;;  %v2531_v22 = vpop.permute.xlu0 %2530 }
 0x2e3   : > { %v2582_v54 = vsel %vm863_vm14, %v2529_v63, %v2531_v22  ;;  %v2583_v55 = vsel %vm863_vm14, %v2531_v22, %v2533_v33 }
 0x2e4   : > { %v4738_v6 = vmax.f32 %v4451_v49, %v2582_v54  ;;  %v4741_v7 = vmax.f32 %v4489_v43, %v2583_v55 }
 0x2e6   : > { %v2557_v34 = vpop.permute.xlu1 %2556  ;;  %2676 = vrot.lane.b32.xlu1 %v4741_v7, %s3241_s26  ;;  %2674 = vrot.lane.b32.xlu0 %v4738_v6, %s3241_s26  ;;  %v2555_v31 = vpop.permute.xlu0 %2554 }
 0x2e7   : > { %v4748_v53 = vsel %vm863_vm14, %v2553_v24, %v2555_v31  ;;  %v2593_v3 = vsel %vm863_vm14, %v2555_v31, %v2557_v34 }
 0x2e8   : > { %v4752_v35 = vmax.f32 %v4503_v21, %v2593_v3 }
 0x2ea   : > { %v2547_v49 = vpop.permute.xlu1 %2546  ;;  %2692 = vrot.lane.b32.xlu1 %v4752_v35, %s3241_s26  ;;  %v2545_v43 = vpop.permute.xlu0 %2544 }
 0x2eb   : > { %v2588_v12 = vsel %vm863_vm14, %v2543_v51, %v2545_v43  ;;  %v2589_v13 = vsel %vm863_vm14, %v2545_v43, %v2547_v49 }
 0x2ec   : > { %v4759_v63 = vmax.f32 %v4474_v26, %v2588_v12  ;;  %v4762_v29 = vmax.f32 %v4517_v38, %v2589_v13 }
 0x2ee   : > { %v2571_v41 = vpop.permute.xlu1 %2570  ;;  %2686 = vrot.lane.b32.xlu0 %v4762_v29, %s3241_s26  ;;  %2684 = vrot.lane.b32.xlu1 %v4759_v63, %s3241_s26  ;;  %v2569_v21 = vpop.permute.xlu0 %2568 }
 0x2ef   : > { %v4769_v23 = vsel %vm863_vm14, %v2567_v44, %v2569_v21  ;;  %v2599_v24 = vsel %vm863_vm14, %v2569_v21, %v2571_v41 }
 0x2f0   : > { %v4773_v51 = vmax.f32 %v4531_v59, %v2599_v24 }
 0x2f2   : > { %v2551_v26 = vpop.permute.xlu1 %2550  ;;  %2702 = vrot.lane.b32.xlu0 %v4773_v51, %s3241_s26  ;;  %v2549_v38 = vpop.permute.xlu0 %2548 }
 0x2f3   : > { %v2590_v16 = vsel %vm863_vm14, %v2547_v49, %v2549_v38  ;;  %v2591_v22 = vsel %vm863_vm14, %v2549_v38, %v2551_v26 }
 0x2f4   : > { %v4780_v54 = vmax.f32 %v4521_v19, %v2590_v16  ;;  %v2639_v44 = vmax.f32 %v4546_v46, %v2591_v22 }
 0x2f6   : > { %v2537_v55 = vpop.permute.xlu1 %2536  ;;  %2690 = vrot.lane.b32.xlu0 %v2639_v44, %s3241_s26  ;;  %2688 = vrot.lane.b32.xlu1 %v4780_v54, %s3241_s26  ;;  %v2559_v59 = vpop.permute.xlu0 %2558 }
 0x2f7   : > { %v2594_v31 = vsel %vm863_vm14, %v2557_v34, %v2559_v59 }
 0x2f8   : > { %v4788_v3 = vmax.f32 %v4507_v52, %v2594_v31 }
 0x2fa   : > { %v2561_v49 = vpop.permute.xlu1 %2560  ;;  %2694 = vrot.lane.b32.xlu0 %v4788_v3, %s3241_s26  ;;  %v2535_v19 = vpop.permute.xlu0 %2534 }
 0x2fb   : > { %v2584_v43 = vsel %vm863_vm14, %v2533_v33, %v2535_v19  ;;  %v2585_v46 = vsel %vm863_vm14, %v2535_v19, %v2537_v55  ;;  %v2595_v21 = vsel %vm863_vm14, %v2559_v59, %v2561_v49  ;;  %v1618_v59 = vsel %vm863_vm14, %v4596_v9, %v4621_v1 }
 0x2fc   : > { %v4795_v12 = vmax.f32 %v4493_v30, %v2584_v43  ;;  %v2633_v13 = vmax.f32 %v4565_v56, %v2585_v46  ;;  %v4803_v24 = vmax.f32 %v4554_v10, %v2595_v21 }
 0x2fe   : > { %v2579_v34 = vpop.permute.xlu1 %2578  ;;  %2680 = vrot.lane.b32.xlu1 %v2633_v13, %s3241_s26  ;;  %2678 = vrot.lane.b32.xlu0 %v4795_v12, %s3241_s26  ;;  %v2573_v52 = vpop.permute.xlu0 %2572  ;;  %v1622_v13 = vsel %vm863_vm14, %v4694_v45, %v4669_v0 }
 0x2ff   : > { %v2600_v33 = vsel %vm863_vm14, %v2571_v41, %v2573_v52 }
 0x300   : > { %v4810_v38 = vmax.f32 %v4535_v36, %v2600_v33  ;;  %v1670_v33 = vmax.f32 %v4398_v61, %v1622_v13  ;;  %v5318_v61 = vld [vmem:[#allocation45_spill] sm:$0xff] }
 0x302   : > { %v2565_v26 = vpop.permute.xlu1 %2564  ;;  %2696 = vrot.lane.b32.xlu1 %v4803_v24, %s3241_s26  ;;  %v2563_v30 = vpop.permute.xlu0 %2562 }
 0x303   : > { %v2596_v56 = vsel %vm863_vm14, %v2561_v49, %v2563_v30  ;;  %v2597_v22 = vsel %vm863_vm14, %v2563_v30, %v2565_v26  ;;  %v1669_v26 = vmax.f32 %v4395_v47, %v4703_v18  ;;  %v1628_v30 = vsel %vm863_vm14, %v4711_v42, %v4667_v4  ;;  %v5319_v18 = vld [vmem:[#allocation48_spill] sm:$0xff]  ;;  %v5320_v42 = vld [vmem:[#allocation38_spill] sm:$0xff] }
 0x304   : > { %v4813_v16 = vmax.f32 %v4569_v37, %v2596_v56  ;;  %v2645_v55 = vmax.f32 %v4588_v8, %v2597_v22  ;;  %v1617_v37 = vsel %vm863_vm14, %v4601_v2, %v4596_v9  ;;  %v1666_v9 = vmax.f32 %v4284_v17, %v1618_v59  ;;  %v5314_v17 = vld [vmem:[#allocation25_spill] sm:$0xff]  ;;  %v5316_v56 = vld [vmem:[#allocation39_spill] sm:$0xff]  ;;  %v5317_v22 = vld [vmem:[#allocation42_spill] sm:$0xff] }
 0x305   : > { %v1665_v2 = vmax.f32 %v4281_v58, %v1617_v37  ;;  %v1675_v47 = vmax.f32 %v5318_v61, %v4715_v14  ;;  %v1619_v4 = vsel %vm863_vm14, %v4621_v1, %v4689_v57  ;;  %v5321_v37 = vld [vmem:[#allocation47_spill] sm:$0xff] }
 0x306   : > { %v2575_v44 = vpop.permute.xlu1 %2574  ;;  %2704 = vrot.lane.b32.xlu1 %v4810_v38, %s3241_s26  ;;  %2698 = vrot.lane.b32.xlu0 %v4813_v16, %s3241_s26  ;;  %v2577_v10 = vpop.permute.xlu0 %2576  ;;  %v1745_v59 = vsel %vm1725_vm0, %v5321_v37, %v5320_v42 }
 0x307   : > { %v2601_v41 = vsel %vm863_vm14, %v2573_v52, %v2575_v44  ;;  %v2602_v31 = vsel %vm863_vm14, %v2575_v44, %v2577_v10  ;;  %v2603_v49 = vsel %vm863_vm14, %v2577_v10, %v2579_v34  ;;  %v5315_v34 = vld [vmem:[#allocation30_spill] sm:$0xff]  ;;  %v1740_v44 = vsel %vm1725_vm0, %v5317_v22, %v5316_v56 }
 0x308   : > { %v4823_v36 = vmax.f32 %v4578_v32, %v2601_v41  ;;  %v4842_v43 = vmax.f32 %v4605_v60, %v2602_v31  ;;  %v2651_v46 = vmax.f32 %v4609_v27, %v2603_v49  ;;  %v1736_v60 = vsel %vm1725_vm0, %v5315_v34, %v5314_v17  ;;  %v5322_v49 = vld [vmem:[#allocation33_spill] sm:$0xff] }
 0x309   : > { %v1737_v27 = vsel %vm1725_vm0, %v5314_v17, %v4234_v50  ;;  %v1782_v0 = vmax.f32 %v1665_v2, %v1736_v60  ;;  %v1787_v10 = vmax.f32 %v1670_v33, %v5316_v56  ;;  %v1786_v41 = vmax.f32 %v1669_v26, %v1740_v44  ;;  %v5328_v56 = vld [vmem:[#allocation32_spill] sm:$0xff]  ;;  %v5329_v44 = vld [vmem:[#allocation35_spill] sm:$0xff] }
 0x30a   : > { %v1821_v19 = vpop.permute.xlu1 %1820  ;;  %2700 = vrot.lane.b32.xlu1 %v2645_v55, %s3241_s26  ;;  %2706 = vrot.lane.b32.xlu0 %v4823_v36, %s3241_s26  ;;  %v1819_v8 = vpop.permute.xlu0 %1818  ;;  %v1783_v45 = vmax.f32 %v1666_v9, %v1737_v27  ;;  %v1676_v55 = vmax.f32 %v5319_v18, %v1628_v30  ;;  %v1623_v31 = vsel %vm863_vm14, %v4615_v25, %v4635_v39  ;;  %v5327_v30 = vld [vmem:[#allocation31_spill] sm:$0xff] }
 0x30b   : > { %v1866_v32 = vsel %vm941_vm15, %v1819_v8, %v1821_v19  ;;  %1911 = vst.msk [vmem:[%s3742_s20 + $0x28] sm:$0xff] %vm1910_vm1, %v1819_v8  ;;  %v1667_v14 = vmax.f32 %v5322_v49, %v1619_v4  ;;  %v5323_v8 = vld [vmem:[#allocation41_spill] sm:$0xff]  ;;  %v1792_v2 = vmax.f32 %v1675_v47, %v1745_v59  ;;  %v1624_v9 = vsel %vm863_vm14, %v4635_v39, %v4631_v48  ;;  %v5325_v39 = vld [vmem:[#allocation34_spill] sm:$0xff]  ;;  %v5331_v47 = vld [vmem:[#allocation44_spill] sm:$0xff] }
 0x30c   : > { %1912 = vst [vmem:[%s3742_s20 + $0x30] sm:$0xff] %v1866_v32  ;;  %v1668_v32 = vmax.f32 %v5323_v8, %v4699_v28  ;;  %v1793_v1 = vmax.f32 %v1676_v55, %v5320_v42  ;;  %v5324_v28 = vld [vmem:[#allocation40_spill] sm:$0xff]  ;;  %v1671_v34 = vmax.f32 %v5325_v39, %v1623_v31  ;;  %v1674_v18 = vmax.f32 %v5331_v47, %v4709_v11  ;;  %v5332_v42 = vld [vmem:[#allocation46_spill] sm:$0xff] }
 0x30d   : > { %v1739_v17 = vsel %vm1725_vm0, %v5324_v28, %v5317_v22  ;;  %v1741_v22 = vsel %vm1725_vm0, %v5328_v56, %v5327_v30  ;;  %v1743_v59 = vsel %vm1725_vm0, %v5329_v44, %v5332_v42  ;;  %v1744_v31 = vsel %vm1725_vm0, %v5332_v42, %v5321_v37 }
 0x30e   : > { %v4849_v21 = vpop.permute.xlu1 %1832  ;;  %2710 = vrot.lane.b32.xlu0 %v2651_v46, %s3241_s26  ;;  %2708 = vrot.lane.b32.xlu1 %v4842_v43, %s3241_s26  ;;  %v1831_v58 = vpop.permute.xlu0 %1830  ;;  %v1791_v49 = vmax.f32 %v1674_v18, %v1744_v31 }
 0x30f   : > { %v1871_v52 = vsel %vm941_vm15, %v1831_v58, %v4849_v21  ;;  %1918 = vst.msk [vmem:[%s3742_s20 + $0xa8] sm:$0xff] %vm1910_vm1, %v1831_v58  ;;  %v1738_v58 = vsel %vm1725_vm0, %v4234_v50, %v5324_v28 }
 0x310   : > { %1919 = vst [vmem:[%s3742_s20 + $0xb0] sm:$0xff] %v1871_v52  ;;  %v1784_v27 = vmax.f32 %v1667_v14, %v1738_v58  ;;  %v1785_v52 = vmax.f32 %v1668_v32, %v1739_v17 }
 0x312   : > { %1842 = vrot.lane.b32.xlu0 %v1782_v0, %s3240_s21  ;;  %1844 = vrot.lane.b32.xlu1 %v1783_v45, %s3240_s21  ;;  %v1625_v45 = vsel %vm863_vm14, %v4631_v48, %v4705_v20  ;;  %v1788_v48 = vmax.f32 %v1671_v34, %v1741_v22 }
 0x316   : > { %1850 = vrot.lane.b32.xlu0 %v1786_v41, %s3240_s21  ;;  %1852 = vrot.lane.b32.xlu1 %v1787_v10, %s3240_s21  ;;  %v1742_v10 = vsel %vm1725_vm0, %v5327_v30, %v5329_v44  ;;  %v5330_v41 = vld [vmem:[#allocation37_spill] sm:$0xff]  ;;  %v5335_v44 = vld [vmem:[#allocation50_spill] sm:$0xff] }
 0x317   : > { %v1673_v61 = vmax.f32 %v5330_v41, %v1625_v45 }
 0x318   : > { %v1823_v57 = vpop.permute.xlu0 %1822 }
 0x319   : > { %v1867_v46 = vsel %vm941_vm15, %v1821_v19, %v1823_v57  ;;  %v1825_v13 = vpop.permute.xlu1 %1824  ;;  %v5326_v19 = vld [vmem:[#allocation36_spill] sm:$0xff]  ;;  %v1790_v11 = vmax.f32 %v1673_v61, %v1743_v59  ;;  %v5336_v59 = vld [vmem:[#allocation51_spill] sm:$0xff] }
 0x31a   : > { %1913 = vst [vmem:[%s3742_s20 + $0x38] sm:$0xff] %v1867_v46  ;;  %v1868_v25 = vsel %vm941_vm15, %v1823_v57, %v1825_v13  ;;  %1862 = vrot.lane.b32.xlu0 %v1792_v2, %s3240_s21  ;;  %1864 = vrot.lane.b32.xlu1 %v1793_v1, %s3240_s21  ;;  %v1672_v60 = vmax.f32 %v5326_v19, %v1624_v9  ;;  %v5333_v9 = vld [vmem:[#allocation43_spill] sm:$0xff]  ;;  %v5334_v19 = vld [vmem:[#allocation49_spill] sm:$0xff] }
 0x31b   : > { %1914 = vst [vmem:[%s3742_s20 + $0x40] sm:$0xff] %v1868_v25  ;;  %v2628_v46 = vmax.f32 %v5333_v9, %v4718_v15 }
 0x31c   : > { %v1827_v0 = vpop.permute.xlu0 %1826  ;;  %v1789_v20 = vmax.f32 %v1672_v60, %v1742_v10  ;;  %v2634_v60 = vmax.f32 %v5334_v19, %v4727_v40 }
 0x31d   : > { %v1869_v50 = vsel %vm941_vm15, %v1825_v13, %v1827_v0  ;;  %v1829_v33 = vpop.permute.xlu1 %1828 }
 0x31e   : > { %1915 = vst [vmem:[%s3742_s20 + $0x48] sm:$0xff] %v1869_v50  ;;  %v1870_v26 = vsel %vm941_vm15, %v1827_v0, %v1829_v33  ;;  %1846 = vrot.lane.b32.xlu0 %v1784_v27, %s3240_s21  ;;  %1848 = vrot.lane.b32.xlu1 %v1785_v52, %s3240_s21 }
 0x31f   : > { %1917 = vst.msk [vmem:[%s3742_s20 + $0x50] sm:$0xff] %vm1916_vm2, %v1870_v26 }
 0x320   : > { %v1835_v55 = vpop.permute.xlu0 %1834 }
 0x321   : > { %v1872_v4 = vsel %vm941_vm15, %v4849_v21, %v1835_v55 }
 0x322   : > { %1920 = vst [vmem:[%s3742_s20 + $0xb8] sm:$0xff] %v1872_v4  ;;  %1854 = vrot.lane.b32.xlu0 %v1788_v48, %s3240_s21  ;;  %1856 = vrot.lane.b32.xlu1 %v1789_v20, %s3240_s21 }
 0x324   : > { %v1837_v14 = vpop.permute.xlu1 %1836 }
 0x325   : > { %v1873_v8 = vsel %vm941_vm15, %v1835_v55, %v1837_v14  ;;  %v1839_v21 = vpop.permute.xlu0 %1838 }
 0x326   : > { %1921 = vst [vmem:[%s3742_s20 + $0xc0] sm:$0xff] %v1873_v8  ;;  %v1874_v32 = vsel %vm941_vm15, %v1837_v14, %v1839_v21  ;;  %1858 = vrot.lane.b32.xlu0 %v1790_v11, %s3240_s21  ;;  %1860 = vrot.lane.b32.xlu1 %v1791_v49, %s3240_s21 }
 0x327   : > { %1922 = vst [vmem:[%s3742_s20 + $0xc8] sm:$0xff] %v1874_v32 }
 0x328   : > { %v1841_v2 = vpop.permute.xlu1 %1840 }
 0x329   : > { %v1875_v1 = vsel %vm941_vm15, %v1839_v21, %v1841_v2 }
 0x32a   : > { %1923 = vst.msk [vmem:[%s3742_s20 + $0xd0] sm:$0xff] %vm1916_vm2, %v1875_v1 }
 0x344   : > { %v2673_v37 = vpop.permute.xlu1 %2672 }
 0x350   : > { %v2683_v57 = vpop.permute.xlu0 %2682 }
 0x358   : > { %v2677_v13 = vpop.permute.xlu1 %2676  ;;  %v2675_v25 = vpop.permute.xlu0 %2674 }
 0x359   : > { %v2713_v28 = vsel %vm2712_vm3, %v2673_v37, %v2675_v25  ;;  %v2714_v58 = vsel %vm2712_vm3, %v2675_v25, %v2677_v13 }
 0x35a   : > { %v2749_v17 = vmax.f32 %v2628_v46, %v2713_v28  ;;  %v2750_v39 = vmax.f32 %v4722_v62, %v2714_v58 }
 0x35c   : > { %v2693_v34 = vpop.permute.xlu1 %2692  ;;  %2791 = vrot.lane.b32.xlu1 %v2750_v39, %s3242_s27  ;;  %2789 = vrot.lane.b32.xlu0 %v2749_v17, %s3242_s27 }
 0x360   : > { %v2685_v27 = vpop.permute.xlu1 %2684  ;;  %v2687_v15 = vpop.permute.xlu0 %2686 }
 0x361   : > { %v2717_v52 = vsel %vm2712_vm3, %v2683_v57, %v2685_v27  ;;  %v2718_v0 = vsel %vm2712_vm3, %v2685_v27, %v2687_v15 }
 0x362   : > { %v2754_v45 = vmax.f32 %v2634_v60, %v2717_v52  ;;  %v2755_v50 = vmax.f32 %v4731_v5, %v2718_v0  ;;  %v2640_v5 = vmax.f32 %v5335_v44, %v4748_v53 }
 0x364   : > { %2799 = vrot.lane.b32.xlu1 %v2754_v45, %s3242_s27  ;;  %2801 = vrot.lane.b32.xlu0 %v2755_v50, %s3242_s27  ;;  %v2703_v62 = vpop.permute.xlu0 %2702 }
 0x368   : > { %v2689_v33 = vpop.permute.xlu1 %2688  ;;  %v2691_v26 = vpop.permute.xlu0 %2690 }
 0x369   : > { %v2720_v30 = vsel %vm2712_vm3, %v2689_v33, %v2691_v26  ;;  %v2758_v40 = vmax.f32 %v4780_v54, %v2691_v26  ;;  %v2719_v56 = vsel %vm2712_vm3, %v2687_v15, %v2689_v33 }
 0x36a   : > { %v2757_v22 = vmax.f32 %v4762_v29, %v2720_v30  ;;  %v2756_v48 = vmax.f32 %v4759_v63, %v2719_v56 }
 0x36b   : > { %2807 = vrot.lane.b32.xlu1 %v2758_v40, %s3242_s27 }
 0x36c   : > { %2805 = vrot.lane.b32.xlu0 %v2757_v22, %s3242_s27  ;;  %v2695_v10 = vpop.permute.xlu0 %2694 }
 0x36d   : > { %v2721_v20 = vsel %vm2712_vm3, %v2693_v34, %v2695_v10 }
 0x36e   : > { %v2759_v41 = vmax.f32 %v2640_v5, %v2721_v20 }
 0x36f   : > { %2803 = vrot.lane.b32.xlu1 %v2756_v48, %s3242_s27 }
 0x370   : > { %v2681_v54 = vpop.permute.xlu1 %2680  ;;  %2809 = vrot.lane.b32.xlu0 %v2759_v41, %s3242_s27  ;;  %v2679_v61 = vpop.permute.xlu0 %2678 }
 0x371   : > { %v2753_v29 = vmax.f32 %v4795_v12, %v2681_v54  ;;  %v2716_v47 = vsel %vm2712_vm3, %v2679_v61, %v2681_v54  ;;  %v2715_v18 = vsel %vm2712_vm3, %v2677_v13, %v2679_v61  ;;  %v2646_v12 = vmax.f32 %v5336_v59, %v4769_v23 }
 0x372   : > { %v2752_v53 = vmax.f32 %v4741_v7, %v2716_v47  ;;  %v2751_v4 = vmax.f32 %v4738_v6, %v2715_v18 }
 0x374   : > { %v2697_v55 = vpop.permute.xlu1 %2696  ;;  %2797 = vrot.lane.b32.xlu0 %v2753_v29, %s3242_s27  ;;  %2795 = vrot.lane.b32.xlu1 %v2752_v53, %s3242_s27 }
 0x375   : > { %v2722_v63 = vsel %vm2712_vm3, %v2695_v10, %v2697_v55 }
 0x376   : > { %v2760_v42 = vmax.f32 %v4752_v35, %v2722_v63 }
 0x378   : > { %v2705_v31 = vpop.permute.xlu1 %2704  ;;  %2811 = vrot.lane.b32.xlu1 %v2760_v42, %s3242_s27  ;;  %2793 = vrot.lane.b32.xlu0 %v2751_v4, %s3242_s27  ;;  %v2699_v7 = vpop.permute.xlu0 %2698 }
 0x379   : > { %v2725_v11 = vsel %vm2712_vm3, %v2703_v62, %v2705_v31  ;;  %v2723_v21 = vsel %vm2712_vm3, %v2697_v55, %v2699_v7 }
 0x37a   : > { %v2764_v49 = vmax.f32 %v2646_v12, %v2725_v11  ;;  %v2761_v1 = vmax.f32 %v4788_v3, %v2723_v21 }
 0x37c   : > { %v2701_v14 = vpop.permute.xlu1 %2700  ;;  %2819 = vrot.lane.b32.xlu1 %v2764_v49, %s3242_s27  ;;  %v2707_v8 = vpop.permute.xlu0 %2706 }
 0x37d   : > { %v2724_v6 = vsel %vm2712_vm3, %v2699_v7, %v2701_v14  ;;  %v2763_v35 = vmax.f32 %v4813_v16, %v2701_v14  ;;  %v2726_v57 = vsel %vm2712_vm3, %v2705_v31, %v2707_v8 }
 0x37e   : > { %v2762_v23 = vmax.f32 %v4803_v24, %v2724_v6  ;;  %v2765_v46 = vmax.f32 %v4773_v51, %v2726_v57 }
 0x37f   : > { %2817 = vrot.lane.b32.xlu0 %v2763_v35, %s3242_s27 }
 0x380   : > { %v2709_v32 = vpop.permute.xlu1 %2708  ;;  %2815 = vrot.lane.b32.xlu1 %v2762_v23, %s3242_s27  ;;  %v2711_v2 = vpop.permute.xlu0 %2710 }
 0x381   : > { %v2727_v37 = vsel %vm2712_vm3, %v2707_v8, %v2709_v32  ;;  %v2728_v3 = vsel %vm2712_vm3, %v2709_v32, %v2711_v2  ;;  %v2768_v25 = vmax.f32 %v4842_v43, %v2711_v2 }
 0x382   : > { %v2766_v16 = vmax.f32 %v4810_v38, %v2727_v37  ;;  %v2767_v51 = vmax.f32 %v4823_v36, %v2728_v3 }
 0x383   : > { %2813 = vrot.lane.b32.xlu0 %v2761_v1, %s3242_s27 }
 0x384   : > { %v1845_v9 = vpop.permute.xlu1 %1844  ;;  %2823 = vrot.lane.b32.xlu1 %v2766_v16, %s3242_s27  ;;  %v1843_v24 = vpop.permute.xlu0 %1842 }
 0x385   : > { %v1876_v13 = vsel %vm941_vm15, %v1843_v24, %v1845_v9  ;;  %1924 = vst.msk [vmem:[%s3742_s20 + $0x128] sm:$0xff] %vm1910_vm1, %v1843_v24 }
 0x386   : > { %1925 = vst [vmem:[%s3742_s20 + $0x130] sm:$0xff] %v1876_v13 }
 0x387   : > { %2821 = vrot.lane.b32.xlu0 %v2765_v46, %s3242_s27 }
 0x388   : > { %v1853_v38 = vpop.permute.xlu1 %1852  ;;  %2827 = vrot.lane.b32.xlu1 %v2768_v25, %s3242_s27  ;;  %v1851_v28 = vpop.permute.xlu0 %1850 }
 0x389   : > { %v1880_v58 = vsel %vm941_vm15, %v1851_v28, %v1853_v38 }
 0x38a   : > { %1929 = vst.msk [vmem:[%s3742_s20 + $0x150] sm:$0xff] %vm1916_vm2, %v1880_v58 }
 0x38b   : > { %2825 = vrot.lane.b32.xlu0 %v2767_v51, %s3242_s27 }
 0x38c   : > { %v1865_v43 = vpop.permute.xlu1 %1864  ;;  %v1863_v17 = vpop.permute.xlu0 %1862 }
 0x38d   : > { %v1885_v39 = vsel %vm941_vm15, %v1863_v17, %v1865_v43 }
 0x38e   : > { %1935 = vst.msk [vmem:[%s3742_s20 + $0x1d0] sm:$0xff] %vm1916_vm2, %v1885_v39 }
 0x390   : > { %v1849_v34 = vpop.permute.xlu1 %1848  ;;  %v1847_v19 = vpop.permute.xlu0 %1846 }
 0x391   : > { %v1879_v60 = vsel %vm941_vm15, %v1849_v34, %v1851_v28  ;;  %v1877_v36 = vsel %vm941_vm15, %v1845_v9, %v1847_v19  ;;  %v1878_v27 = vsel %vm941_vm15, %v1847_v19, %v1849_v34 }
 0x392   : > { %1928 = vst [vmem:[%s3742_s20 + $0x148] sm:$0xff] %v1879_v60  ;;  %1926 = vst [vmem:[%s3742_s20 + $0x138] sm:$0xff] %v1877_v36 }
 0x393   : > { %1927 = vst [vmem:[%s3742_s20 + $0x140] sm:$0xff] %v1878_v27 }
 0x394   : > { %v1857_v15 = vpop.permute.xlu1 %1856  ;;  %v1855_v52 = vpop.permute.xlu0 %1854 }
 0x395   : > { %v1881_v0 = vsel %vm941_vm15, %v1855_v52, %v1857_v15  ;;  %1930 = vst.msk [vmem:[%s3742_s20 + $0x1a8] sm:$0xff] %vm1910_vm1, %v1855_v52 }
 0x396   : > { %1931 = vst [vmem:[%s3742_s20 + $0x1b0] sm:$0xff] %v1881_v0 }
 0x398   : > { %v1861_v45 = vpop.permute.xlu1 %1860  ;;  %v1859_v50 = vpop.permute.xlu0 %1858 }
 0x399   : > { %v1884_v62 = vsel %vm941_vm15, %v1861_v45, %v1863_v17  ;;  %v1882_v33 = vsel %vm941_vm15, %v1857_v15, %v1859_v50  ;;  %v1883_v26 = vsel %vm941_vm15, %v1859_v50, %v1861_v45 }
 0x39a   : > { %1934 = vst [vmem:[%s3742_s20 + $0x1c8] sm:$0xff] %v1884_v62  ;;  %1932 = vst [vmem:[%s3742_s20 + $0x1b8] sm:$0xff] %v1882_v33 }
 0x39b   : > { %1933 = vst [vmem:[%s3742_s20 + $0x1c0] sm:$0xff] %v1883_v26 }
 0x3ce   : > { %v2792_v30 = vpop.permute.xlu1 %2791  ;;  %v2790_v40 = vpop.permute.xlu0 %2789 }
 0x3cf   : > { %v2829_v56 = vsel %vm1916_vm2, %v2790_v40, %v2792_v30  ;;  %2870 = vst.msk [vmem:[%s3742_s20 + $0x50] sm:$0xff] %vm2869_vm4, %v2790_v40 }
 0x3d0   : > { %2871 = vst [vmem:[%s3742_s20 + $0x58] sm:$0xff] %v2829_v56 }
 0x3d6   : > { %v2800_v22 = vpop.permute.xlu1 %2799  ;;  %v2802_v44 = vpop.permute.xlu0 %2801 }
 0x3d7   : > { %2877 = vst.msk [vmem:[%s3742_s20 + $0xd0] sm:$0xff] %vm2869_vm4, %v2800_v22  ;;  %v2833_v5 = vsel %vm1916_vm2, %v2800_v22, %v2802_v44 }
 0x3d8   : > { %2878 = vst [vmem:[%s3742_s20 + $0xd8] sm:$0xff] %v2833_v5 }
 0x3dd   : > { %v2808_v10 = vpop.permute.xlu1 %2807 }
 0x3de   : > { %2882 = vst.msk [vmem:[%s3742_s20 + $0xf8] sm:$0xff] %vm2875_vm5, %v2808_v10  ;;  %v2806_v48 = vpop.permute.xlu0 %2805 }
 0x3df   : > { %v2836_v20 = vsel %vm1916_vm2, %v2806_v48, %v2808_v10 }
 0x3e0   : > { %2881 = vst [vmem:[%s3742_s20 + $0xf0] sm:$0xff] %v2836_v20 }
 0x3e1   : > { %v2804_v41 = vpop.permute.xlu1 %2803 }
 0x3e2   : > { %v2834_v54 = vsel %vm1916_vm2, %v2802_v44, %v2804_v41  ;;  %v2835_v61 = vsel %vm1916_vm2, %v2804_v41, %v2806_v48  ;;  %v2810_v29 = vpop.permute.xlu0 %2809 }
 0x3e3   : > { %2879 = vst [vmem:[%s3742_s20 + $0xe0] sm:$0xff] %v2834_v54  ;;  %2880 = vst [vmem:[%s3742_s20 + $0xe8] sm:$0xff] %v2835_v61 }
 0x3e4   : > { %2883 = vst.msk [vmem:[%s3742_s20 + $0x150] sm:$0xff] %vm2869_vm4, %v2810_v29 }
 0x3e6   : > { %v2796_v47 = vpop.permute.xlu1 %2795  ;;  %v2798_v53 = vpop.permute.xlu0 %2797 }
 0x3e7   : > { %v2832_v18 = vsel %vm1916_vm2, %v2796_v47, %v2798_v53  ;;  %2876 = vst.msk [vmem:[%s3742_s20 + $0x78] sm:$0xff] %vm2875_vm5, %v2798_v53 }
 0x3e8   : > { %2874 = vst [vmem:[%s3742_s20 + $0x70] sm:$0xff] %v2832_v18 }
 0x3ea   : > { %v2812_v55 = vpop.permute.xlu1 %2811  ;;  %v2794_v63 = vpop.permute.xlu0 %2793 }
 0x3eb   : > { %v2837_v4 = vsel %vm1916_vm2, %v2810_v29, %v2812_v55  ;;  %v2830_v42 = vsel %vm1916_vm2, %v2792_v30, %v2794_v63  ;;  %v2831_v59 = vsel %vm1916_vm2, %v2794_v63, %v2796_v47 }
 0x3ec   : > { %2884 = vst [vmem:[%s3742_s20 + $0x158] sm:$0xff] %v2837_v4  ;;  %2872 = vst [vmem:[%s3742_s20 + $0x60] sm:$0xff] %v2830_v42 }
 0x3ed   : > { %2873 = vst [vmem:[%s3742_s20 + $0x68] sm:$0xff] %v2831_v59 }
 0x3ee   : > { %v2820_v12 = vpop.permute.xlu1 %2819 }
 0x3ef   : > { %2889 = vst.msk [vmem:[%s3742_s20 + $0x1d0] sm:$0xff] %vm2869_vm4, %v2820_v12 }
 0x3f1   : > { %v2818_v31 = vpop.permute.xlu0 %2817 }
 0x3f2   : > { %2888 = vst.msk [vmem:[%s3742_s20 + $0x178] sm:$0xff] %vm2875_vm5, %v2818_v31  ;;  %v2816_v7 = vpop.permute.xlu1 %2815 }
 0x3f3   : > { %v2840_v11 = vsel %vm1916_vm2, %v2816_v7, %v2818_v31 }
 0x3f4   : > { %2887 = vst [vmem:[%s3742_s20 + $0x170] sm:$0xff] %v2840_v11 }
 0x3f5   : > { %v2814_v49 = vpop.permute.xlu0 %2813 }
 0x3f6   : > { %v2838_v14 = vsel %vm1916_vm2, %v2812_v55, %v2814_v49  ;;  %v2839_v8 = vsel %vm1916_vm2, %v2814_v49, %v2816_v7  ;;  %v2824_v6 = vpop.permute.xlu1 %2823 }
 0x3f7   : > { %2885 = vst [vmem:[%s3742_s20 + $0x160] sm:$0xff] %v2838_v14  ;;  %2886 = vst [vmem:[%s3742_s20 + $0x168] sm:$0xff] %v2839_v8 }
 0x3f9   : > { %v2822_v35 = vpop.permute.xlu0 %2821 }
 0x3fa   : > { %v2841_v21 = vsel %vm1916_vm2, %v2820_v12, %v2822_v35  ;;  %v2842_v23 = vsel %vm1916_vm2, %v2822_v35, %v2824_v6  ;;  %v2828_v32 = vpop.permute.xlu1 %2827 }
 0x3fb   : > { %2890 = vst [vmem:[%s3742_s20 + $0x1d8] sm:$0xff] %v2841_v21  ;;  %2891 = vst [vmem:[%s3742_s20 + $0x1e0] sm:$0xff] %v2842_v23 }
 0x3fc   : > { %2894 = vst.msk [vmem:[%s3742_s20 + $0x1f8] sm:$0xff] %vm2875_vm5, %v2828_v32 }
 0x3fd   : > { %v2826_v2 = vpop.permute.xlu0 %2825 }
 0x3fe   : > { %v2843_v1 = vsel %vm1916_vm2, %v2824_v6, %v2826_v2  ;;  %v2844_v37 = vsel %vm1916_vm2, %v2826_v2, %v2828_v32 }
 0x3ff   : > { %2892 = vst [vmem:[%s3742_s20 + $0x1e8] sm:$0xff] %v2843_v1  ;;  %2893 = vst [vmem:[%s3742_s20 + $0x1f0] sm:$0xff] %v2844_v37 }
 0x400   : > { %3182 = shalt.err (!%p3179_p10)
}
 0x401   : > { %s3183_s10 = scalar_lea.hbm %s5086_s5, 8192  ;;  %s3187_s13 = scalar_lea.hbm %s5138_s3, 16384 }
 0x402   : > { %p3184_p2 = scmp.ne.s32.totalorder %s5086_s5, %s3183_s10  ;;  %p3188_p7 = scmp.lt.s32.totalorder %s5086_s5, %s5138_s3 }
 0x403   : > { %p3189_p5 = scmp.lt.s32.totalorder %s3187_s13, %s3183_s10 }
 0x404   : > { %p3185_p4 = pnand %p3184_p2, %p5337_p12 }
 0x405   : > { %p3190_p6 = por %p3189_p5, %p3188_p7 }
 0x406   : > { %p3186_p9 = pneg %p3185_p4 }
 0x408   : > { %p3191_p11 = pnand %p3190_p6, %p3186_p9 }
 0x40a   : > { %3194 = shalt.err (!%p3191_p11)
}
 0x40b   : > { %s3244_s21 = smov 2048   ;;  %s3245_s26 = smov 128  }
 0x40c   : > { %3088 = dma.vmem_to_hbm [thread:$0]  (%p5337_p12), %s5088_s30, 8192, %s5086_s5, %s2896_s2, %s3244_s21, %s3244_s21, %s3245_s26  }
 0x40d PF: > { %s2924_s27 = sand.u32 1, %s3221_s14   ;;  %p5338_p13 = scmp.ne.s32.totalorder %s5213_s25, 0 }
 0x40e   : > { %p5339_p0 = scmp.ge.s32.totalorder %s3233_s17, 2  ;;  %s2925_s29 = scalar_lea.sflag [#allocation5], %s2924_s27 }
 0x410   : > { %p3095_p1 = pnand %p5339_p0, %p5338_p13 }
 0x412   : > { %p3096_p3 = pneg %p3095_p1 }
 0x414   : > { %3216 = dma.done.wait (%p3096_p3), %s2925_s29, 8192  }
 0x415   : > { %3218 = vsyncadd (%p3096_p3), %s2925_s29, 4294959104  ;;  %p17_p8 = scmp.ge.s32.totalorder %s3294_s19, 4   ;;  %s5340_s14 = smov %s3225_s15 }
 0x416   : > { %s5341_s15 = smov %s3229_s16  ;;  %s5342_s16 = smov %s3306_s22 }
 0x417   : > { %s5343_s17 = smov %s3294_s19  ;;  %19 = sbr.rel (!%p17_p8) target bundleno = 7 (0x7), region = 77 }
 0x41c   :  { %2930 = vsyncpa [#allocation4], 1 }
 0x41d   :  { %2932 = vsyncpa [#allocation4 + $0x1], 1 }
 0x41e   :  { %2933 = vsyncpa [#allocation5], 1 }
 0x41f   :  { %2935 = vsyncpa [#allocation5 + $0x1], 1 }

</bundles_post_ra>
